<compile_context>
chip_gen: v5e
topology: v5e:2x2
jax: 0.10.0
libtpu: 0.0.40
codegen_flags: <defaults>
</compile_context>

<pallas_src>
import functools
import math
from typing import NamedTuple, Tuple

import jax
import jax.numpy as jnp
from jax.experimental import pallas as pl
from jax.experimental.pallas import tpu as pltpu

BN_EPS = 1e-5


def _round_up(n, m):
    return ((n + m - 1) // m) * m


def _pad_to(a, rows, cols, fill=0.0):
    return jnp.pad(a, ((0, rows - a.shape[0]), (0, cols - a.shape[1])),
                   constant_values=fill)


class MlpMeta(NamedTuple):
    """Static shape metadata (plain Python ints; never traced)."""
    n_inputs: int
    h_dims: Tuple[int, int, int, int]
    n_outputs: int
    in_p: int
    hp: int
    op: int


# --------------------------------------------------------------------------
# Kernel body
# --------------------------------------------------------------------------
def _mlp_kernel(x_ref, w1_ref, w2_ref, w3_ref, w4_ref, w5_ref, b5_ref,
                out_ref, *, hp, op):
    """Fused forward pass.  All feature dims are pre-padded to multiples of
    128; x / weights are bf16 (MXU inputs), BN / softmax math is f32.
    Outputs are packed into one lane-dense f32 slab so every store is a full
    unmasked vst."""

    def bn_relu(h):
        # BatchNorm1d over the batch axis, biased variance (training mode),
        # gamma=1, beta=0.  Two-pass variance + clamp: numerically safe for
        # near-constant columns, and costs nothing (body is not slot-bound).
        mean = jnp.mean(h, axis=0, keepdims=True)
        c = h - mean
        var = jnp.maximum(jnp.mean(c * c, axis=0, keepdims=True), 0.0)
        return jnp.maximum(c * jax.lax.rsqrt(var + BN_EPS), 0.0)

    h = x_ref[...]  # bf16 [B, in_p]
    for i, w_ref in enumerate((w1_ref, w2_ref, w3_ref, w4_ref)):
        h = bn_relu(jnp.dot(h.astype(jnp.bfloat16), w_ref[...],
                            preferred_element_type=jnp.float32))
        out_ref[:, i * hp:(i + 1) * hp] = h  # 128-aligned full-width store

    logits = (jnp.dot(h.astype(jnp.bfloat16), w5_ref[...],
                      preferred_element_type=jnp.float32) + b5_ref[...])
    out_ref[:, 4 * hp:4 * hp + op] = logits

    # softmax over dim=1; padded logit columns carry a -1e30 bias -> exp == 0.
    m = jnp.max(logits, axis=1, keepdims=True)
    e = jnp.exp(logits - m)
    out_ref[:, 4 * hp + op:4 * hp + 2 * op] = e / jnp.sum(e, axis=1,
                                                          keepdims=True)


# --------------------------------------------------------------------------
# One-time parameter prep (hoisted out of the per-call hot path)
# --------------------------------------------------------------------------
def prepare_params(params):
    """Pad every feature dim to a multiple of 128 and cast matmul inputs to
    bf16 ONCE.  Returns (device param tuple, static MlpMeta)."""
    w1, w2, w3, w4, w5, b5 = params
    n_inputs = w1.shape[0]
    h_dims = (w1.shape[1], w2.shape[1], w3.shape[1], w4.shape[1])
    n_outputs = w5.shape[1]

    in_p = _round_up(n_inputs, 128)
    hp = _round_up(max(h_dims), 128)       # 300..303 -> 384
    op = _round_up(n_outputs, 128)

    # bf16 MXU inputs; zero padding keeps padded feature columns exactly zero.
    w1p = _pad_to(w1, in_p, hp).astype(jnp.bfloat16)
    w2p = _pad_to(w2, hp, hp).astype(jnp.bfloat16)
    w3p = _pad_to(w3, hp, hp).astype(jnp.bfloat16)
    w4p = _pad_to(w4, hp, hp).astype(jnp.bfloat16)
    w5p = _pad_to(w5, hp, op).astype(jnp.bfloat16)
    # Padded bias columns get -1e30 so padded logits vanish from the softmax.
    b5p = _pad_to(b5.reshape(1, -1), 1, op, fill=-1e30).astype(jnp.float32)

    prepared = jax.device_put((w1p, w2p, w3p, w4p, w5p, b5p))
    meta = MlpMeta(n_inputs, h_dims, n_outputs, in_p, hp, op)
    return prepared, meta


# --------------------------------------------------------------------------
# Forward wrapper (hot path: pad x, one pallas_call, static slab views)
# --------------------------------------------------------------------------
def mlp_forward(x, prepared_params, *, meta: MlpMeta):
    """Returns (logits, hiddens) like the PyTorch module:
    hiddens = [h1, h2, h3, h4, softmax(logits)]."""
    w1p, w2p, w3p, w4p, w5p, b5p = prepared_params
    x = x.reshape(-1, meta.n_inputs)        # x.view(-1, n_inputs)
    B = x.shape[0]                          # batch rows are NEVER padded (BN)
    xp = _pad_to(x, B, meta.in_p).astype(jnp.bfloat16)

    hp, op = meta.hp, meta.op
    slab_cols = 4 * hp + 2 * op
    vmem = pl.BlockSpec(memory_space=pltpu.MemorySpace.VMEM)

    slab = pl.pallas_call(
        functools.partial(_mlp_kernel, hp=hp, op=op),
        out_shape=jax.ShapeDtypeStruct((B, slab_cols), jnp.float32),
        in_specs=[vmem] * 7,
        out_specs=vmem,
    )(xp, w1p, w2p, w3p, w4p, w5p, b5p)

    # Static 128-aligned views; fused by XLA under jit.
    hiddens = [slab[:, i * hp:i * hp + d] for i, d in enumerate(meta.h_dims)]
    logits = slab[:, 4 * hp:4 * hp + meta.n_outputs]
    sm = slab[:, 4 * hp + op:4 * hp + op + meta.n_outputs]
    return logits, hiddens + [sm]


# --------------------------------------------------------------------------
# Init (matches torch: xavier_uniform_ weights, zero bias) & pure-JAX reference
# --------------------------------------------------------------------------
def xavier_uniform(key, fan_in, fan_out):
    """torch.nn.init.xavier_uniform_ bound; stored as (in, out) so the kernel
    computes x @ W (== x @ W_torch.T)."""
    bound = math.sqrt(6.0 / (fan_in + fan_out))
    return jax.random.uniform(key, (fan_in, fan_out), jnp.float32,
                              minval=-bound, maxval=bound)


def init_params(key, n_inputs, n_outputs):
    dims = [n_inputs, 300, 301, 302, 303, n_outputs]
    keys = jax.random.split(key, 5)
    ws = [xavier_uniform(keys[i], dims[i], dims[i + 1]) for i in range(5)]
    b5 = jnp.zeros((1, n_outputs), jnp.float32)
    return (*ws, b5)


def mlp_forward_ref(x, params):
    """Pure-JAX reference, precision-matched to the kernel (bf16 matmul inputs,
    f32 accumulate + f32 BatchNorm/softmax)."""
    w1, w2, w3, w4, w5, b5 = params
    x = x.reshape(-1, w1.shape[0])

    def dot16(a, b):
        return jnp.dot(a.astype(jnp.bfloat16), b.astype(jnp.bfloat16),
                       preferred_element_type=jnp.float32)

    def bn_relu(h):
        mean = jnp.mean(h, axis=0, keepdims=True)
        var = jnp.mean((h - mean) ** 2, axis=0, keepdims=True)
        return jnp.maximum((h - mean) / jnp.sqrt(var + BN_EPS), 0.0)

    h1 = bn_relu(dot16(x, w1))
    h2 = bn_relu(dot16(h1, w2))
    h3 = bn_relu(dot16(h2, w3))
    h4 = bn_relu(dot16(h3, w4))
    logits = dot16(h4, w5) + b5
    return logits, [h1, h2, h3, h4, jax.nn.softmax(logits, axis=1)]


# TODO(synk): BatchNorm1d running_mean/running_var (momentum) buffer updates
# are training side-effects not returned by forward(); they are omitted here.

if __name__ == "__main__":
    key = jax.random.PRNGKey(0)
    k_param, k_x = jax.random.split(key)

    n_inputs, n_outputs, batch = 32, 10, 8
    params = init_params(k_param, n_inputs, n_outputs)

    # One-time weight prep (pad + bf16 cast) OUTSIDE the per-call hot path.
    prepared, meta = prepare_params(params)

    x = jax.random.normal(k_x, (batch, n_inputs), jnp.float32)

    fwd = jax.jit(functools.partial(mlp_forward, meta=meta))
    logits, hiddens = fwd(x, prepared)
    jax.block_until_ready(logits)
    for h in hiddens:
        jax.block_until_ready(h)

    # sanity check vs precision-matched pure-JAX reference
    ref_logits, ref_hiddens = mlp_forward_ref(x, params)
    assert logits.shape == (batch, n_outputs)
    assert jnp.allclose(logits, ref_logits, atol=1e-2, rtol=1e-2)
    for a, b in zip(hiddens, ref_hiddens):
        assert a.shape == b.shape
        assert jnp.allclose(a, b, atol=1e-2, rtol=1e-2)
    # softmax rows sum to 1 (exact divide in kernel)
    assert jnp.allclose(jnp.sum(hiddens[-1], axis=1), 1.0, atol=1e-5)

    print("KERNEL_OK")
</pallas_src>

<mosaic_0001>
module attributes {stable_mosaic.version = 11 : i64} {
  func.func @_mlp_kernel(%arg0: memref<8x128xbf16, #tpu.memory_space<vmem>>, %arg1: memref<128x384xbf16, #tpu.memory_space<vmem>>, %arg2: memref<384x384xbf16, #tpu.memory_space<vmem>>, %arg3: memref<384x384xbf16, #tpu.memory_space<vmem>>, %arg4: memref<384x384xbf16, #tpu.memory_space<vmem>>, %arg5: memref<384x128xbf16, #tpu.memory_space<vmem>>, %arg6: memref<1x128xf32, #tpu.memory_space<vmem>>, %arg7: memref<8x1792xf32, #tpu.memory_space<vmem>>) attributes {dimension_semantics = [], scalar_prefetch = 0 : i64, scratch_operands = 0 : i64, tpu.core_type = #tpu.core_type<tc>} {
    %c0 = arith.constant 0 : index
    %c0_0 = arith.constant 0 : index
    %0 = vector.load %arg0[%c0, %c0_0] : memref<8x128xbf16, #tpu.memory_space<vmem>>, vector<8x128xbf16>
    %c0_1 = arith.constant 0 : index
    %c0_2 = arith.constant 0 : index
    %1 = vector.load %arg1[%c0_1, %c0_2] : memref<128x384xbf16, #tpu.memory_space<vmem>>, vector<128x384xbf16>
    %cst = arith.constant dense<0.000000e+00> : vector<8x384xf32>
    %2 = tpu.matmul %0, %1, %cst {dimension_numbers = #tpu.dot_dimension_numbers<[1], [0], [0], [1], [0, 0, 1, 1], [], []>} : vector<8x128xbf16>, vector<128x384xbf16>, vector<8x384xf32> -> vector<8x384xf32>
    %cst_3 = arith.constant dense<0.000000e+00> : vector<384xf32>
    %3 = vector.multi_reduction <add>, %2, %cst_3 [0] : vector<8x384xf32> to vector<384xf32>
    %4 = vector.shape_cast %3 : vector<384xf32> to vector<1x384xf32>
    %cst_4 = arith.constant 8.000000e+00 : f32
    %5 = vector.broadcast %cst_4 : f32 to vector<1x384xf32>
    %6 = arith.divf %4, %5 : vector<1x384xf32>
    %7 = vector.broadcast %6 : vector<1x384xf32> to vector<8x384xf32>
    %8 = arith.subf %2, %7 : vector<8x384xf32>
    %9 = arith.mulf %8, %8 : vector<8x384xf32>
    %cst_5 = arith.constant dense<0.000000e+00> : vector<384xf32>
    %10 = vector.multi_reduction <add>, %9, %cst_5 [0] : vector<8x384xf32> to vector<384xf32>
    %11 = vector.shape_cast %10 : vector<384xf32> to vector<1x384xf32>
    %cst_6 = arith.constant 8.000000e+00 : f32
    %12 = vector.broadcast %cst_6 : f32 to vector<1x384xf32>
    %13 = arith.divf %11, %12 : vector<1x384xf32>
    %cst_7 = arith.constant 0.000000e+00 : f32
    %14 = vector.broadcast %cst_7 : f32 to vector<1x384xf32>
    %15 = arith.maximumf %13, %14 : vector<1x384xf32>
    %cst_8 = arith.constant 9.99999974E-6 : f32
    %16 = vector.broadcast %cst_8 : f32 to vector<1x384xf32>
    %17 = arith.addf %15, %16 : vector<1x384xf32>
    %18 = math.rsqrt %17 : vector<1x384xf32>
    %19 = vector.broadcast %18 : vector<1x384xf32> to vector<8x384xf32>
    %20 = arith.mulf %8, %19 : vector<8x384xf32>
    %cst_9 = arith.constant 0.000000e+00 : f32
    %21 = vector.broadcast %cst_9 : f32 to vector<8x384xf32>
    %22 = arith.maximumf %20, %21 : vector<8x384xf32>
    %c0_10 = arith.constant 0 : index
    %c0_11 = arith.constant 0 : index
    %23 = vector.load %arg7[%c0_10, %c0_11] : memref<8x1792xf32, #tpu.memory_space<vmem>>, vector<8x384xf32>
    tpu.vector_store %arg7[%c0_10, %c0_11], %22 {strides = array<i32>} : memref<8x1792xf32, #tpu.memory_space<vmem>>, vector<8x384xf32>,
    %24 = arith.truncf %22 : vector<8x384xf32> to vector<8x384xbf16>
    %c0_12 = arith.constant 0 : index
    %c0_13 = arith.constant 0 : index
    %25 = vector.load %arg2[%c0_12, %c0_13] : memref<384x384xbf16, #tpu.memory_space<vmem>>, vector<384x384xbf16>
    %cst_14 = arith.constant dense<0.000000e+00> : vector<8x384xf32>
    %26 = tpu.matmul %24, %25, %cst_14 {dimension_numbers = #tpu.dot_dimension_numbers<[1], [0], [0], [1], [0, 0, 1, 1], [], []>} : vector<8x384xbf16>, vector<384x384xbf16>, vector<8x384xf32> -> vector<8x384xf32>
    %cst_15 = arith.constant dense<0.000000e+00> : vector<384xf32>
    %27 = vector.multi_reduction <add>, %26, %cst_15 [0] : vector<8x384xf32> to vector<384xf32>
    %28 = vector.shape_cast %27 : vector<384xf32> to vector<1x384xf32>
    %cst_16 = arith.constant 8.000000e+00 : f32
    %29 = vector.broadcast %cst_16 : f32 to vector<1x384xf32>
    %30 = arith.divf %28, %29 : vector<1x384xf32>
    %31 = vector.broadcast %30 : vector<1x384xf32> to vector<8x384xf32>
    %32 = arith.subf %26, %31 : vector<8x384xf32>
    %33 = arith.mulf %32, %32 : vector<8x384xf32>
    %cst_17 = arith.constant dense<0.000000e+00> : vector<384xf32>
    %34 = vector.multi_reduction <add>, %33, %cst_17 [0] : vector<8x384xf32> to vector<384xf32>
    %35 = vector.shape_cast %34 : vector<384xf32> to vector<1x384xf32>
    %cst_18 = arith.constant 8.000000e+00 : f32
    %36 = vector.broadcast %cst_18 : f32 to vector<1x384xf32>
    %37 = arith.divf %35, %36 : vector<1x384xf32>
    %cst_19 = arith.constant 0.000000e+00 : f32
    %38 = vector.broadcast %cst_19 : f32 to vector<1x384xf32>
    %39 = arith.maximumf %37, %38 : vector<1x384xf32>
    %cst_20 = arith.constant 9.99999974E-6 : f32
    %40 = vector.broadcast %cst_20 : f32 to vector<1x384xf32>
    %41 = arith.addf %39, %40 : vector<1x384xf32>
    %42 = math.rsqrt %41 : vector<1x384xf32>
    %43 = vector.broadcast %42 : vector<1x384xf32> to vector<8x384xf32>
    %44 = arith.mulf %32, %43 : vector<8x384xf32>
    %cst_21 = arith.constant 0.000000e+00 : f32
    %45 = vector.broadcast %cst_21 : f32 to vector<8x384xf32>
    %46 = arith.maximumf %44, %45 : vector<8x384xf32>
    %c0_22 = arith.constant 0 : index
    %c384 = arith.constant 384 : index
    %47 = vector.load %arg7[%c0_22, %c384] : memref<8x1792xf32, #tpu.memory_space<vmem>>, vector<8x384xf32>
    tpu.vector_store %arg7[%c0_22, %c384], %46 {strides = array<i32>} : memref<8x1792xf32, #tpu.memory_space<vmem>>, vector<8x384xf32>,
    %48 = arith.truncf %46 : vector<8x384xf32> to vector<8x384xbf16>
    %c0_23 = arith.constant 0 : index
    %c0_24 = arith.constant 0 : index
    %49 = vector.load %arg3[%c0_23, %c0_24] : memref<384x384xbf16, #tpu.memory_space<vmem>>, vector<384x384xbf16>
    %cst_25 = arith.constant dense<0.000000e+00> : vector<8x384xf32>
    %50 = tpu.matmul %48, %49, %cst_25 {dimension_numbers = #tpu.dot_dimension_numbers<[1], [0], [0], [1], [0, 0, 1, 1], [], []>} : vector<8x384xbf16>, vector<384x384xbf16>, vector<8x384xf32> -> vector<8x384xf32>
    %cst_26 = arith.constant dense<0.000000e+00> : vector<384xf32>
    %51 = vector.multi_reduction <add>, %50, %cst_26 [0] : vector<8x384xf32> to vector<384xf32>
    %52 = vector.shape_cast %51 : vector<384xf32> to vector<1x384xf32>
    %cst_27 = arith.constant 8.000000e+00 : f32
    %53 = vector.broadcast %cst_27 : f32 to vector<1x384xf32>
    %54 = arith.divf %52, %53 : vector<1x384xf32>
    %55 = vector.broadcast %54 : vector<1x384xf32> to vector<8x384xf32>
    %56 = arith.subf %50, %55 : vector<8x384xf32>
    %57 = arith.mulf %56, %56 : vector<8x384xf32>
    %cst_28 = arith.constant dense<0.000000e+00> : vector<384xf32>
    %58 = vector.multi_reduction <add>, %57, %cst_28 [0] : vector<8x384xf32> to vector<384xf32>
    %59 = vector.shape_cast %58 : vector<384xf32> to vector<1x384xf32>
    %cst_29 = arith.constant 8.000000e+00 : f32
    %60 = vector.broadcast %cst_29 : f32 to vector<1x384xf32>
    %61 = arith.divf %59, %60 : vector<1x384xf32>
    %cst_30 = arith.constant 0.000000e+00 : f32
    %62 = vector.broadcast %cst_30 : f32 to vector<1x384xf32>
    %63 = arith.maximumf %61, %62 : vector<1x384xf32>
    %cst_31 = arith.constant 9.99999974E-6 : f32
    %64 = vector.broadcast %cst_31 : f32 to vector<1x384xf32>
    %65 = arith.addf %63, %64 : vector<1x384xf32>
    %66 = math.rsqrt %65 : vector<1x384xf32>
    %67 = vector.broadcast %66 : vector<1x384xf32> to vector<8x384xf32>
    %68 = arith.mulf %56, %67 : vector<8x384xf32>
    %cst_32 = arith.constant 0.000000e+00 : f32
    %69 = vector.broadcast %cst_32 : f32 to vector<8x384xf32>
    %70 = arith.maximumf %68, %69 : vector<8x384xf32>
    %c0_33 = arith.constant 0 : index
    %c768 = arith.constant 768 : index
    %71 = vector.load %arg7[%c0_33, %c768] : memref<8x1792xf32, #tpu.memory_space<vmem>>, vector<8x384xf32>
    tpu.vector_store %arg7[%c0_33, %c768], %70 {strides = array<i32>} : memref<8x1792xf32, #tpu.memory_space<vmem>>, vector<8x384xf32>,
    %72 = arith.truncf %70 : vector<8x384xf32> to vector<8x384xbf16>
    %c0_34 = arith.constant 0 : index
    %c0_35 = arith.constant 0 : index
    %73 = vector.load %arg4[%c0_34, %c0_35] : memref<384x384xbf16, #tpu.memory_space<vmem>>, vector<384x384xbf16>
    %cst_36 = arith.constant dense<0.000000e+00> : vector<8x384xf32>
    %74 = tpu.matmul %72, %73, %cst_36 {dimension_numbers = #tpu.dot_dimension_numbers<[1], [0], [0], [1], [0, 0, 1, 1], [], []>} : vector<8x384xbf16>, vector<384x384xbf16>, vector<8x384xf32> -> vector<8x384xf32>
    %cst_37 = arith.constant dense<0.000000e+00> : vector<384xf32>
    %75 = vector.multi_reduction <add>, %74, %cst_37 [0] : vector<8x384xf32> to vector<384xf32>
    %76 = vector.shape_cast %75 : vector<384xf32> to vector<1x384xf32>
    %cst_38 = arith.constant 8.000000e+00 : f32
    %77 = vector.broadcast %cst_38 : f32 to vector<1x384xf32>
    %78 = arith.divf %76, %77 : vector<1x384xf32>
    %79 = vector.broadcast %78 : vector<1x384xf32> to vector<8x384xf32>
    %80 = arith.subf %74, %79 : vector<8x384xf32>
    %81 = arith.mulf %80, %80 : vector<8x384xf32>
    %cst_39 = arith.constant dense<0.000000e+00> : vector<384xf32>
    %82 = vector.multi_reduction <add>, %81, %cst_39 [0] : vector<8x384xf32> to vector<384xf32>
    %83 = vector.shape_cast %82 : vector<384xf32> to vector<1x384xf32>
    %cst_40 = arith.constant 8.000000e+00 : f32
    %84 = vector.broadcast %cst_40 : f32 to vector<1x384xf32>
    %85 = arith.divf %83, %84 : vector<1x384xf32>
    %cst_41 = arith.constant 0.000000e+00 : f32
    %86 = vector.broadcast %cst_41 : f32 to vector<1x384xf32>
    %87 = arith.maximumf %85, %86 : vector<1x384xf32>
    %cst_42 = arith.constant 9.99999974E-6 : f32
    %88 = vector.broadcast %cst_42 : f32 to vector<1x384xf32>
    %89 = arith.addf %87, %88 : vector<1x384xf32>
    %90 = math.rsqrt %89 : vector<1x384xf32>
    %91 = vector.broadcast %90 : vector<1x384xf32> to vector<8x384xf32>
    %92 = arith.mulf %80, %91 : vector<8x384xf32>
    %cst_43 = arith.constant 0.000000e+00 : f32
    %93 = vector.broadcast %cst_43 : f32 to vector<8x384xf32>
    %94 = arith.maximumf %92, %93 : vector<8x384xf32>
    %c0_44 = arith.constant 0 : index
    %c1152 = arith.constant 1152 : index
    %95 = vector.load %arg7[%c0_44, %c1152] : memref<8x1792xf32, #tpu.memory_space<vmem>>, vector<8x384xf32>
    tpu.vector_store %arg7[%c0_44, %c1152], %94 {strides = array<i32>} : memref<8x1792xf32, #tpu.memory_space<vmem>>, vector<8x384xf32>,
    %96 = arith.truncf %94 : vector<8x384xf32> to vector<8x384xbf16>
    %c0_45 = arith.constant 0 : index
    %c0_46 = arith.constant 0 : index
    %97 = vector.load %arg5[%c0_45, %c0_46] : memref<384x128xbf16, #tpu.memory_space<vmem>>, vector<384x128xbf16>
    %cst_47 = arith.constant dense<0.000000e+00> : vector<8x128xf32>
    %98 = tpu.matmul %96, %97, %cst_47 {dimension_numbers = #tpu.dot_dimension_numbers<[1], [0], [0], [1], [0, 0, 1, 1], [], []>} : vector<8x384xbf16>, vector<384x128xbf16>, vector<8x128xf32> -> vector<8x128xf32>
    %c0_48 = arith.constant 0 : index
    %c0_49 = arith.constant 0 : index
    %99 = vector.load %arg6[%c0_48, %c0_49] : memref<1x128xf32, #tpu.memory_space<vmem>>, vector<1x128xf32>
    %100 = vector.broadcast %99 : vector<1x128xf32> to vector<8x128xf32>
    %101 = arith.addf %98, %100 : vector<8x128xf32>
    %c0_50 = arith.constant 0 : index
    %c1536 = arith.constant 1536 : index
    %102 = vector.load %arg7[%c0_50, %c1536] : memref<8x1792xf32, #tpu.memory_space<vmem>>, vector<8x128xf32>
    tpu.vector_store %arg7[%c0_50, %c1536], %101 {strides = array<i32>} : memref<8x1792xf32, #tpu.memory_space<vmem>>, vector<8x128xf32>,
    %cst_51 = arith.constant dense<0xFF800000> : vector<8xf32>
    %103 = vector.multi_reduction <maximumf>, %101, %cst_51 [1] : vector<8x128xf32> to vector<8xf32>
    %104 = vector.shape_cast %103 : vector<8xf32> to vector<8x1xf32>
    %105 = vector.broadcast %104 : vector<8x1xf32> to vector<8x128xf32>
    %106 = arith.subf %101, %105 : vector<8x128xf32>
    %107 = math.exp %106 : vector<8x128xf32>
    %cst_52 = arith.constant dense<0.000000e+00> : vector<8xf32>
    %108 = vector.multi_reduction <add>, %107, %cst_52 [1] : vector<8x128xf32> to vector<8xf32>
    %109 = vector.shape_cast %108 : vector<8xf32> to vector<8x1xf32>
    %110 = vector.broadcast %109 : vector<8x1xf32> to vector<8x128xf32>
    %111 = arith.divf %107, %110 : vector<8x128xf32>
    %c0_53 = arith.constant 0 : index
    %c1664 = arith.constant 1664 : index
    %112 = vector.load %arg7[%c0_53, %c1664] : memref<8x1792xf32, #tpu.memory_space<vmem>>, vector<8x128xf32>
    tpu.vector_store %arg7[%c0_53, %c1664], %111 {strides = array<i32>} : memref<8x1792xf32, #tpu.memory_space<vmem>>, vector<8x128xf32>,
    return
  }
}

</mosaic_0001>

<bundles_post_ra>
// kernel: mlp_forward.1
= control target key start
LH: loop header
LB: loop body
LE: loop exit
PB: predicated region body
PF: predicated region fallthrough
CT: control target
= control target key end

     0   :  { %12 = vsyncpa [#allocation3], 0  ;;  %s4535_s0 = inlined_call_operand.vmem [shape: bf16[8,128], index: 0, kind: input, shape index: {}]   ;;  %s4536_s1 = inlined_call_operand.hbm [shape: bf16[128,384], index: 1, kind: input, shape index: {}]   ;;  %s4537_s2 = inlined_call_operand.hbm [shape: bf16[384,384], index: 2, kind: input, shape index: {}]   ;;  %s4538_s3 = inlined_call_operand.hbm [shape: bf16[384,384], index: 3, kind: input, shape index: {}]   ;;  %s4539_s4 = inlined_call_operand.hbm [shape: bf16[384,384], index: 4, kind: input, shape index: {}]   ;;  %s4540_s5 = inlined_call_operand.hbm [shape: bf16[384,128], index: 5, kind: input, shape index: {}]   ;;  %s4541_s6 = inlined_call_operand.vmem [shape: f32[1,128], index: 6, kind: input, shape index: {}]   ;;  %s4542_s7 = inlined_call_operand.vmem [shape: f32[8,1792], index: 7, kind: output, shape index: {}]  }
   0x1   :  { %13 = vsyncpa [#allocation5], 0 }
   0x2   :  { %14 = vsyncpa [#allocation8], 0  ;;  %s34_s26 = sshll.u32 %s4537_s2, 4  ;;  %s4239_s27 = smov [#allocation4]   ;;  %s35_s26 = int_to_ptr.hbm [resolvable:$true] %s34_s26 }
   0x3   :  { %s36_s28 = sshll.u32 %s4239_s27, 4  ;;  %s60_s8 = sshll.u32 %s4539_s4, 4  ;;  %s37_s28 = int_to_ptr.vmem [resolvable:$true] %s36_s28  ;;  %s61_s8 = int_to_ptr.hbm [resolvable:$true] %s60_s8 }
   0x4   :  { %s4240_s9 = smov 192   ;;  %s4241_s10 = smov 12  }
   0x5   :  { %42 = dma.hbm_to_vmem [thread:$0]  %s35_s26, 9216, %s37_s28, [#allocation5], %s4240_s9, %s4240_s9, %s4241_s10  }
   0x6   :  { %s4242_s11 = smov [#allocation7]   ;;  %s21_s15 = sshll.u32 %s4536_s1, 4  ;;  %s22_s15 = int_to_ptr.hbm [resolvable:$true] %s21_s15 }
   0x7   :  { %s62_s12 = sshll.u32 %s4242_s11, 4  ;;  %s47_s17 = sshll.u32 %s4538_s3, 4  ;;  %s63_s12 = int_to_ptr.vmem [resolvable:$true] %s62_s12  ;;  %s48_s17 = int_to_ptr.hbm [resolvable:$true] %s47_s17 }
   0x8   :  { %68 = dma.hbm_to_vmem [thread:$0]  %s61_s8, 9216, %s63_s12, [#allocation8], %s4240_s9, %s4240_s9, %s4241_s10  }
   0x9   :  { %s4243_s18 = smov [#allocation2]   ;;  %s4244_s4 = smov [#allocation6]  }
   0xa   :  { %s23_s19 = sshll.u32 %s4243_s18, 4  ;;  %s49_s20 = sshll.u32 %s4244_s4, 4  ;;  %s24_s19 = int_to_ptr.vmem [resolvable:$true] %s23_s19  ;;  %s50_s20 = int_to_ptr.vmem [resolvable:$true] %s49_s20 }
   0xb   :  { %29 = dma.hbm_to_vmem [thread:$0]  %s22_s15, 3072, %s24_s19, [#allocation3], %s4240_s9, %s4240_s9, %s4241_s10  }
   0xc   :  { %s73_s23 = sshll.u32 %s4540_s5, 4  ;;  %s4245_s1 = smov [#allocation9]   ;;  %s74_s23 = int_to_ptr.hbm [resolvable:$true] %s73_s23 }
   0xd   :  { %55 = dma.hbm_to_vmem [thread:$0]  %s48_s17, 9216, %s50_s20, [#allocation5], %s4240_s9, %s4240_s9, %s4241_s10  }
   0xe   :  { %s75_s24 = sshll.u32 %s4245_s1, 4  ;;  %s4246_s25 = smov 64   ;;  %s76_s24 = int_to_ptr.vmem [resolvable:$true] %s75_s24 }
   0xf   :  { %s4247_s26 = smov 4  }
  0x10   :  { %81 = dma.hbm_to_vmem [thread:$0]  %s74_s23, 3072, %s76_s24, [#allocation8], %s4246_s25, %s4246_s25, %s4247_s26  }
  0x11   :  { %4233 = dma.done.wait [#allocation3], 3072  }
  0x12   :  { %4234 = vsyncadd [#allocation3], 4294964224 }
  0x13   :  { %4235 = dma.done.wait [#allocation5], 18432  }
  0x14   :  { %4236 = vsyncadd [#allocation5], 4294948864 }
  0x15   :  { %4237 = dma.done.wait [#allocation8], 12288  }
  0x16   :  { %4238 = vsyncadd [#allocation8], 4294955008  ;;  %v2838_v0 = vld [vmem:[#allocation2 + $0xa8] sm:$0xf]  ;;  %v3830_v1 = vld [vmem:[#allocation2 + $0xb0] sm:$0xf0] }
  0x17   :  { %v3829_v2 = vld [vmem:[#allocation2 + $0xac] sm:$0xf]  ;;  %v2839_v3 = vor.u32 %v3830_v1, %v2838_v0  ;;  %v2840_v4 = vld [vmem:[#allocation2 + $0xb4] sm:$0xf0]  ;;  %v2846_v5 = vld [vmem:[#allocation2 + $0xb0] sm:$0xf] }
  0x18   :  { %v3831_v6 = vld [vmem:[#allocation2 + $0xb8] sm:$0xf0]  ;;  %v2843_v7 = vor.u32 %v3829_v2, %v2840_v4  ;;  %v2826_v9 = vld [vmem:[#allocation2 + $0x90] sm:$0xf]  ;;  %v3826_v11 = vld [vmem:[#allocation2 + $0x94] sm:$0xf] }
  0x19   :  { %v2847_v8 = vor.u32 %v3831_v6, %v2846_v5  ;;  %v3827_v10 = vld [vmem:[#allocation2 + $0x98] sm:$0xf0]  ;;  %265 = vmatpush.bf16.msra.mxu0 %v2839_v3  ;;  %v2828_v13 = vld [vmem:[#allocation2 + $0x9c] sm:$0xf0]  ;;  %v2834_v14 = vld [vmem:[#allocation2 + $0x98] sm:$0xf] }
  0x1a   :  { %v2827_v12 = vor.u32 %v3827_v10, %v2826_v9  ;;  %v3828_v15 = vld [vmem:[#allocation2 + $0xa0] sm:$0xf0]  ;;  %278 = vmatpush.bf16.msra.mxu1 %v2843_v7  ;;  %v2831_v16 = vor.u32 %v3826_v11, %v2828_v13  ;;  %v2814_v18 = vld [vmem:[#allocation2 + $0x78] sm:$0xf]  ;;  %v3823_v20 = vld [vmem:[#allocation2 + $0x7c] sm:$0xf] }
  0x1b   :  { %291 = vmatpush.bf16.msra.mxu2 %v2847_v8  ;;  %v2835_v17 = vor.u32 %v3828_v15, %v2834_v14  ;;  %v3824_v19 = vld [vmem:[#allocation2 + $0x80] sm:$0xf0]  ;;  %v2816_v21 = vld [vmem:[#allocation2 + $0x84] sm:$0xf0]  ;;  %v2822_v22 = vld [vmem:[#allocation2 + $0x80] sm:$0xf] }
  0x1c   :  { %v3825_v23 = vld [vmem:[#allocation2 + $0x88] sm:$0xf0]  ;;  %v2815_v24 = vor.u32 %v3824_v19, %v2814_v18  ;;  %v2819_v25 = vor.u32 %v3823_v20, %v2816_v21  ;;  %v2802_v27 = vld [vmem:[#allocation2 + $0x60] sm:$0xf]  ;;  %v3820_v29 = vld [vmem:[#allocation2 + $0x64] sm:$0xf] }
  0x1d   :  { %266 = vmatpush.bf16.msra.mxu0 %v2827_v12  ;;  %v2823_v26 = vor.u32 %v3825_v23, %v2822_v22  ;;  %v3821_v28 = vld [vmem:[#allocation2 + $0x68] sm:$0xf0]  ;;  %v2804_v30 = vld [vmem:[#allocation2 + $0x6c] sm:$0xf0]  ;;  %v2810_v31 = vld [vmem:[#allocation2 + $0x68] sm:$0xf] }
  0x1e   :  { %279 = vmatpush.bf16.msra.mxu1 %v2831_v16  ;;  %v3822_v32 = vld [vmem:[#allocation2 + $0x70] sm:$0xf0]  ;;  %v2803_v33 = vor.u32 %v3821_v28, %v2802_v27  ;;  %v2807_v34 = vor.u32 %v3820_v29, %v2804_v30  ;;  %v2790_v36 = vld [vmem:[#allocation2 + $0x48] sm:$0xf]  ;;  %v3817_v38 = vld [vmem:[#allocation2 + $0x4c] sm:$0xf] }
  0x1f   :  { %292 = vmatpush.bf16.msra.mxu2 %v2835_v17  ;;  %v2811_v35 = vor.u32 %v3822_v32, %v2810_v31  ;;  %v3818_v37 = vld [vmem:[#allocation2 + $0x50] sm:$0xf0]  ;;  %v2792_v39 = vld [vmem:[#allocation2 + $0x54] sm:$0xf0]  ;;  %v2798_v40 = vld [vmem:[#allocation2 + $0x50] sm:$0xf] }
  0x20   :  { %v3819_v41 = vld [vmem:[#allocation2 + $0x58] sm:$0xf0]  ;;  %v2791_v42 = vor.u32 %v3818_v37, %v2790_v36  ;;  %v2778_v43 = vld [vmem:[#allocation2 + $0x30] sm:$0xf]  ;;  %v2795_v44 = vor.u32 %v3817_v38, %v2792_v39  ;;  %v3814_v47 = vld [vmem:[#allocation2 + $0x34] sm:$0xf] }
  0x21   :  { %267 = vmatpush.bf16.msra.mxu0 %v2815_v24  ;;  %v2799_v45 = vor.u32 %v3819_v41, %v2798_v40  ;;  %v3815_v46 = vld [vmem:[#allocation2 + $0x38] sm:$0xf0]  ;;  %v2780_v48 = vld [vmem:[#allocation2 + $0x3c] sm:$0xf0]  ;;  %v2786_v49 = vld [vmem:[#allocation2 + $0x38] sm:$0xf] }
  0x22   :  { %280 = vmatpush.bf16.msra.mxu1 %v2819_v25  ;;  %v3816_v50 = vld [vmem:[#allocation2 + $0x40] sm:$0xf0]  ;;  %v2779_v51 = vor.u32 %v3815_v46, %v2778_v43  ;;  %v2783_v52 = vor.u32 %v3814_v47, %v2780_v48  ;;  %v2766_v54 = vld [vmem:[#allocation2 + $0x18] sm:$0xf]  ;;  %v3811_v56 = vld [vmem:[#allocation2 + $0x1c] sm:$0xf] }
  0x23   :  { %293 = vmatpush.bf16.msra.mxu2 %v2823_v26  ;;  %v2787_v53 = vor.u32 %v3816_v50, %v2786_v49  ;;  %v3812_v55 = vld [vmem:[#allocation2 + $0x20] sm:$0xf0]  ;;  %v2768_v57 = vld [vmem:[#allocation2 + $0x24] sm:$0xf0]  ;;  %v2774_v58 = vld [vmem:[#allocation2 + $0x20] sm:$0xf] }
  0x24   :  { %v3813_v59 = vld [vmem:[#allocation2 + $0x28] sm:$0xf0]  ;;  %v2767_v60 = vor.u32 %v3812_v55, %v2766_v54  ;;  %v2771_v61 = vor.u32 %v3811_v56, %v2768_v57  ;;  %v2754_v63 = vld [vmem:[#allocation2] sm:$0xf]  ;;  %v3808_v1 = vld [vmem:[#allocation2 + $0x4] sm:$0xf] }
  0x25   :  { %268 = vmatpush.bf16.msra.mxu0 %v2803_v33  ;;  %v2775_v62 = vor.u32 %v3813_v59, %v2774_v58  ;;  %v3809_v0 = vld [vmem:[#allocation2 + $0x8] sm:$0xf0]  ;;  %v2756_v2 = vld [vmem:[#allocation2 + $0xc] sm:$0xf0]  ;;  %v2762_v3 = vld [vmem:[#allocation2 + $0x8] sm:$0xf] }
  0x26   :  { %281 = vmatpush.bf16.msra.mxu1 %v2807_v34  ;;  %v3810_v4 = vld [vmem:[#allocation2 + $0x10] sm:$0xf0]  ;;  %v2755_v5 = vor.u32 %v3809_v0, %v2754_v63  ;;  %v2759_v6 = vor.u32 %v3808_v1, %v2756_v2  ;;  %v104_v8 = vld [vmem:[%s4535_s0] sm:$0xf]  ;;  %v2934_v9 = vld [vmem:[#allocation4 + $0xa8] sm:$0xf] }
  0x27   :  { %294 = vmatpush.bf16.msra.mxu2 %v2811_v35  ;;  %v2763_v7 = vor.u32 %v3810_v4, %v2762_v3  ;;  %v3854_v10 = vld [vmem:[#allocation4 + $0xb0] sm:$0xf0]  ;;  %v2922_v12 = vld [vmem:[#allocation4 + $0x90] sm:$0xf]  ;;  %v3851_v13 = vld [vmem:[#allocation4 + $0x98] sm:$0xf0] }
  0x28   :  { %v2935_v11 = vor.u32 %v3854_v10, %v2934_v9  ;;  %v2923_v14 = vor.u32 %v3851_v13, %v2922_v12  ;;  %v2910_v15 = vld [vmem:[#allocation4 + $0x78] sm:$0xf]  ;;  %v3848_v16 = vld [vmem:[#allocation4 + $0x80] sm:$0xf0]  ;;  %v2898_v18 = vld [vmem:[#allocation4 + $0x60] sm:$0xf] }
  0x29   :  { %269 = vmatpush.bf16.msra.mxu0 %v2791_v42  ;;  %v2911_v17 = vor.u32 %v3848_v16, %v2910_v15  ;;  %v3845_v19 = vld [vmem:[#allocation4 + $0x68] sm:$0xf0]  ;;  %v3030_v21 = vld [vmem:[#allocation4 + $0x168] sm:$0xf]  ;;  %v3878_v22 = vld [vmem:[#allocation4 + $0x170] sm:$0xf0] }
  0x2a   :  { %282 = vmatpush.bf16.msra.mxu1 %v2795_v44  ;;  %887 = vmatpush.bf16.msra.mxu3 %v2935_v11  ;;  %v2899_v20 = vor.u32 %v3845_v19, %v2898_v18  ;;  %v3853_v23 = vld [vmem:[#allocation4 + $0xac] sm:$0xf]  ;;  %v3031_v24 = vor.u32 %v3878_v22, %v3030_v21  ;;  %v2936_v25 = vld [vmem:[#allocation4 + $0xb4] sm:$0xf0]  ;;  %v4248_v26 = vmov 8.0  }
  0x2b   :  { %295 = vmatpush.bf16.msra.mxu2 %v2799_v45  ;;  %4083 = vrcp.f32 %v4248_v26  ;;  %v2939_v27 = vor.u32 %v3853_v23, %v2936_v25  ;;  %v2886_v28 = vld [vmem:[#allocation4 + $0x48] sm:$0xf]  ;;  %v3842_v29 = vld [vmem:[#allocation4 + $0x50] sm:$0xf0]  ;;  %v3018_v31 = vld [vmem:[#allocation4 + $0x150] sm:$0xf] }
  0x2c   :  { %v2887_v30 = vor.u32 %v3842_v29, %v2886_v28  ;;  %v3875_v32 = vld [vmem:[#allocation4 + $0x158] sm:$0xf0]  ;;  %v3850_v33 = vld [vmem:[#allocation4 + $0x94] sm:$0xf]  ;;  %v2924_v35 = vld [vmem:[#allocation4 + $0x9c] sm:$0xf0] }
  0x2d   :  { %270 = vmatpush.bf16.msra.mxu0 %v2779_v51  ;;  %v3019_v34 = vor.u32 %v3875_v32, %v3018_v31  ;;  %v2927_v36 = vor.u32 %v3850_v33, %v2924_v35  ;;  %v3126_v37 = vld [vmem:[#allocation4 + $0x228] sm:$0xf]  ;;  %v3902_v38 = vld [vmem:[#allocation4 + $0x230] sm:$0xf0]  ;;  %v2874_v40 = vld [vmem:[#allocation4 + $0x30] sm:$0xf] }
  0x2e   :  { %283 = vmatpush.bf16.msra.mxu1 %v2783_v52  ;;  %888 = vmatpush.bf16.msra.mxu3 %v2923_v14  ;;  %v3127_v39 = vor.u32 %v3902_v38, %v3126_v37  ;;  %v3839_v41 = vld [vmem:[#allocation4 + $0x38] sm:$0xf0]  ;;  %v3006_v44 = vld [vmem:[#allocation4 + $0x138] sm:$0xf]  ;;  %v3872_v45 = vld [vmem:[#allocation4 + $0x140] sm:$0xf0] }
  0x2f   :  { %296 = vmatpush.bf16.msra.mxu2 %v2787_v53  ;;  %v2875_v43 = vor.u32 %v3839_v41, %v2874_v40  ;;  %v3847_v46 = vld [vmem:[#allocation4 + $0x7c] sm:$0xf]  ;;  %v3007_v47 = vor.u32 %v3872_v45, %v3006_v44  ;;  %v2912_v48 = vld [vmem:[#allocation4 + $0x84] sm:$0xf0]  ;;  %v3114_v50 = vld [vmem:[#allocation4 + $0x210] sm:$0xf] }
  0x30   :  { %v2915_v49 = vor.u32 %v3847_v46, %v2912_v48  ;;  %v3899_v51 = vld [vmem:[#allocation4 + $0x218] sm:$0xf0]  ;;  %v2862_v54 = vld [vmem:[#allocation4 + $0x18] sm:$0xf]  ;;  %v3836_v55 = vld [vmem:[#allocation4 + $0x20] sm:$0xf0] }
  0x31   :  { %271 = vmatpush.bf16.msra.mxu0 %v2767_v60  ;;  %v4307_v42 = vpop.eup %4083  ;;  %v3115_v53 = vor.u32 %v3899_v51, %v3114_v50  ;;  %v2863_v56 = vor.u32 %v3836_v55, %v2862_v54  ;;  %v2994_v57 = vld [vmem:[#allocation4 + $0x120] sm:$0xf]  ;;  %v3869_v58 = vld [vmem:[#allocation4 + $0x128] sm:$0xf0]  ;;  %v3844_v59 = vld [vmem:[#allocation4 + $0x64] sm:$0xf] }
  0x32   :  { %284 = vmatpush.bf16.msra.mxu1 %v2771_v61  ;;  %889 = vmatpush.bf16.msra.mxu3 %v2911_v17  ;;  %v323_v52 = vmul.f32 8.0, %v4307_v42  ;;  %v2995_v60 = vor.u32 %v3869_v58, %v2994_v57  ;;  %v2900_v61 = vld [vmem:[#allocation4 + $0x6c] sm:$0xf0]  ;;  %v3102_v63 = vld [vmem:[#allocation4 + $0x1f8] sm:$0xf]  ;;  %vm327_vm0 = vweird.f32 %v4307_v42 }
  0x33   :  { %297 = vmatpush.bf16.msra.mxu2 %v2775_v62  ;;  %v2903_v62 = vor.u32 %v3844_v59, %v2900_v61  ;;  %v3896_v0 = vld [vmem:[#allocation4 + $0x200] sm:$0xf0]  ;;  %v2850_v3 = vld [vmem:[#allocation4] sm:$0xf]  ;;  %v3833_v4 = vld [vmem:[#allocation4 + $0x8] sm:$0xf0] }
  0x34   :  { %v324_v1 = vsub.f32 1.0, %v323_v52  ;;  %v3103_v2 = vor.u32 %v3896_v0, %v3102_v63  ;;  %v2888_v11 = vld [vmem:[#allocation4 + $0x54] sm:$0xf0]  ;;  %v3877_v12 = vld [vmem:[#allocation4 + $0x16c] sm:$0xf] }
  0x35   :  { %272 = vmatpush.bf16.msra.mxu0 %v2755_v5  ;;  %v2851_v5 = vor.u32 %v3833_v4, %v2850_v3  ;;  %v3032_v13 = vld [vmem:[#allocation4 + $0x174] sm:$0xf0]  ;;  %v3090_v18 = vld [vmem:[#allocation4 + $0x1e0] sm:$0xf]  ;;  %v3893_v19 = vld [vmem:[#allocation4 + $0x1e8] sm:$0xf0] }
  0x36   :  { %285 = vmatpush.bf16.msra.mxu1 %v2759_v6  ;;  %890 = vmatpush.bf16.msra.mxu3 %v2899_v20  ;;  %v2982_v6 = vld [vmem:[#allocation4 + $0x108] sm:$0xf]  ;;  %v3035_v17 = vor.u32 %v3877_v12, %v3032_v13  ;;  %v325_v20 = vmul.f32 %v4307_v42, %v324_v1  ;;  %v3091_v22 = vor.u32 %v3893_v19, %v3090_v18  ;;  %v3863_v25 = vld [vmem:[#allocation4 + $0xf8] sm:$0xf0]  ;;  %v3838_v26 = vld [vmem:[#allocation4 + $0x34] sm:$0xf] }
  0x37   :  { %298 = vmatpush.bf16.msra.mxu2 %v2763_v7  ;;  %v3866_v7 = vld [vmem:[#allocation4 + $0x110] sm:$0xf0]  ;;  %v2876_v29 = vld [vmem:[#allocation4 + $0x3c] sm:$0xf0]  ;;  %v3078_v35 = vld [vmem:[#allocation4 + $0x1c8] sm:$0xf] }
  0x38   :  { %273 = vmatmul.bf16.vlgmr.msra.gmra.mxu0 %v104_v8  ;;  %v2983_v10 = vor.u32 %v3866_v7, %v2982_v6  ;;  %v3020_v31 = vld [vmem:[#allocation4 + $0x15c] sm:$0xf0]  ;;  %v2879_v33 = vor.u32 %v3838_v26, %v2876_v29  ;;  %v326_v37 = vadd.f32 %v4307_v42, %v325_v20  ;;  %v3860_v44 = vld [vmem:[#allocation4 + $0xe0] sm:$0xf0]  ;;  %v3835_v45 = vld [vmem:[#allocation4 + $0x1c] sm:$0xf] }
  0x39   :  { %286 = vmatmul.bf16.vlgmr.msra.gmra.mxu1 %v104_v8  ;;  %900 = vmatpush.bf16.msrb.mxu0 %v3031_v24  ;;  %v2970_v24 = vld [vmem:[#allocation4 + $0xf0] sm:$0xf]  ;;  %v2864_v50 = vld [vmem:[#allocation4 + $0x24] sm:$0xf0]  ;;  %v3871_v51 = vld [vmem:[#allocation4 + $0x13c] sm:$0xf] }
  0x3a   :  { %299 = vmatmul.bf16.vlgmr.msra.gmra.mxu2 %v104_v8  ;;  %891 = vmatpush.bf16.msra.mxu3 %v2887_v30  ;;  %v3841_v8 = vld [vmem:[#allocation4 + $0x4c] sm:$0xf]  ;;  %v2971_v28 = vor.u32 %v3863_v25, %v2970_v24  ;;  %v3874_v30 = vld [vmem:[#allocation4 + $0x154] sm:$0xf]  ;;  %v2867_v54 = vor.u32 %v3835_v45, %v2864_v50  ;;  %v3008_v55 = vld [vmem:[#allocation4 + $0x144] sm:$0xf0]  ;;  %v4327_v57 = vsel %vm327_vm0, %v4307_v42, %v326_v37 }
  0x3b   :  { %926 = vmatpush.bf16.msrb.mxu2 %v2939_v27  ;;  %913 = vmatpush.bf16.msrb.mxu1 %v3127_v39  ;;  %v2891_v16 = vor.u32 %v3841_v8, %v2888_v11  ;;  %v3887_v61 = vld [vmem:[#allocation4 + $0x1b8] sm:$0xf0]  ;;  %v2946_v0 = vld [vmem:[#allocation4 + $0xc0] sm:$0xf]  ;;  %v3857_v1 = vld [vmem:[#allocation4 + $0xc8] sm:$0xf0] }
  0x3c   :  { %v2852_v6 = vld [vmem:[#allocation4 + $0xc] sm:$0xf0]  ;;  %v3868_v7 = vld [vmem:[#allocation4 + $0x124] sm:$0xf]  ;;  %v3901_v11 = vld [vmem:[#allocation4 + $0x22c] sm:$0xf] }
  0x3d   :  { %901 = vmatpush.bf16.msrb.mxu0 %v3019_v34  ;;  %v3023_v34 = vor.u32 %v3874_v30, %v3020_v31  ;;  %v3128_v12 = vld [vmem:[#allocation4 + $0x234] sm:$0xf0]  ;;  %v3038_v18 = vld [vmem:[#allocation4 + $0x170] sm:$0xf]  ;;  %v3879_v19 = vld [vmem:[#allocation4 + $0x178] sm:$0xf0] }
  0x3e   :  { %892 = vmatpush.bf16.msra.mxu3 %v2875_v43  ;;  %v2958_v43 = vld [vmem:[#allocation4 + $0xd8] sm:$0xf]  ;;  %v3884_v24 = vld [vmem:[#allocation4 + $0x1a0] sm:$0xf0]  ;;  %v3865_v25 = vld [vmem:[#allocation4 + $0x10c] sm:$0xf] }
  0x3f   :  { %927 = vmatpush.bf16.msrb.mxu2 %v2927_v36  ;;  %914 = vmatpush.bf16.msrb.mxu1 %v3115_v53  ;;  %v3890_v36 = vld [vmem:[#allocation4 + $0x1d0] sm:$0xf0]  ;;  %v3054_v20 = vld [vmem:[#allocation4 + $0x198] sm:$0xf] }
  0x40   :  { %v3079_v39 = vor.u32 %v3890_v36, %v3078_v35  ;;  %v2984_v26 = vld [vmem:[#allocation4 + $0x114] sm:$0xf0]  ;;  %v3055_v29 = vor.u32 %v3884_v24, %v3054_v20  ;;  %v3898_v31 = vld [vmem:[#allocation4 + $0x214] sm:$0xf]  ;;  %v3876_v35 = vld [vmem:[#allocation4 + $0x160] sm:$0xf0] }
  0x41   :  { %902 = vmatpush.bf16.msrb.mxu0 %v3007_v47  ;;  %v2987_v30 = vor.u32 %v3865_v25, %v2984_v26  ;;  %v3042_v36 = vld [vmem:[#allocation4 + $0x180] sm:$0xf]  ;;  %v3856_v20 = vld [vmem:[#allocation4 + $0xc4] sm:$0xf]  ;;  %v3889_v26 = vld [vmem:[#allocation4 + $0x1cc] sm:$0xf] }
  0x42   :  { %893 = vmatpush.bf16.msra.mxu3 %v2863_v56  ;;  %v3066_v56 = vld [vmem:[#allocation4 + $0x1b0] sm:$0xf] }
  0x43   :  { %928 = vmatpush.bf16.msrb.mxu2 %v2915_v49  ;;  %915 = vmatpush.bf16.msrb.mxu1 %v3103_v2  ;;  %v2959_v49 = vor.u32 %v3860_v44, %v2958_v43  ;;  %v3067_v63 = vor.u32 %v3887_v61, %v3066_v56  ;;  %v3832_v2 = vld [vmem:[#allocation4 + $0x4] sm:$0xf]  ;;  %v3855_v43 = vld [vmem:[#allocation4 + $0xb8] sm:$0xf0]  ;;  %v3014_v56 = vld [vmem:[#allocation4 + $0x140] sm:$0xf] }
  0x44   :  { %v2855_v8 = vor.u32 %v3832_v2, %v2852_v6  ;;  %v3859_v2 = vld [vmem:[#allocation4 + $0xdc] sm:$0xf] }
  0x45   :  { %903 = vmatpush.bf16.msrb.mxu0 %v2995_v60  ;;  %v3011_v60 = vor.u32 %v3871_v51, %v3008_v55 }
  0x46   :  { %894 = vmatpush.bf16.msra.mxu3 %v2851_v5  ;;  %v2947_v5 = vor.u32 %v3857_v1, %v2946_v0 }
  0x47   :  { %929 = vmatpush.bf16.msrb.mxu2 %v2903_v62  ;;  %916 = vmatpush.bf16.msrb.mxu1 %v3091_v22 }
  0x49   :  { %904 = vmatpush.bf16.msrb.mxu0 %v2983_v10  ;;  %v2996_v10 = vld [vmem:[#allocation4 + $0x12c] sm:$0xf0] }
  0x4a   :  { %939 = vmatpush.bf16.msrb.mxu3 %v3035_v17  ;;  %v3131_v17 = vor.u32 %v3901_v11, %v3128_v12  ;;  %v3870_v11 = vld [vmem:[#allocation4 + $0x130] sm:$0xf0] }
  0x4b   :  { %930 = vmatpush.bf16.msrb.mxu2 %v2891_v16  ;;  %917 = vmatpush.bf16.msrb.mxu1 %v3079_v39  ;;  %v2999_v16 = vor.u32 %v3868_v7, %v2996_v10  ;;  %v3881_v39 = vld [vmem:[#allocation4 + $0x188] sm:$0xf0]  ;;  %v3892_v7 = vld [vmem:[#allocation4 + $0x1e4] sm:$0xf]  ;;  %v3002_v10 = vld [vmem:[#allocation4 + $0x128] sm:$0xf] }
  0x4c   :  { %v3043_v45 = vor.u32 %v3881_v39, %v3042_v36 }
  0x4d   :  { %905 = vmatpush.bf16.msrb.mxu0 %v2971_v28 }
  0x4e   :  { %940 = vmatpush.bf16.msrb.mxu3 %v3023_v34  ;;  %v3026_v34 = vld [vmem:[#allocation4 + $0x158] sm:$0xf] }
  0x4f   :  { %931 = vmatpush.bf16.msrb.mxu2 %v2879_v33  ;;  %918 = vmatpush.bf16.msrb.mxu1 %v3067_v63  ;;  %v3852_v63 = vld [vmem:[#allocation4 + $0xa0] sm:$0xf0] }
  0x51   :  { %906 = vmatpush.bf16.msrb.mxu0 %v2959_v49 }
  0x52   :  { %941 = vmatpush.bf16.msrb.mxu3 %v3011_v60 }
  0x53   :  { %932 = vmatpush.bf16.msrb.mxu2 %v2867_v54  ;;  %919 = vmatpush.bf16.msrb.mxu1 %v3055_v29 }
  0x55   :  { %907 = vmatpush.bf16.msrb.mxu0 %v2947_v5 }
  0x56   :  { %942 = vmatpush.bf16.msrb.mxu3 %v2999_v16  ;;  %v2918_v16 = vld [vmem:[#allocation4 + $0x80] sm:$0xf] }
  0x57   :  { %933 = vmatpush.bf16.msrb.mxu2 %v2855_v8  ;;  %920 = vmatpush.bf16.msrb.mxu1 %v3043_v45  ;;  %v3864_v45 = vld [vmem:[#allocation4 + $0x100] sm:$0xf0] }
  0x59   :  { %952 = vmatpush.bf16.msra.mxu0 %v3131_v17  ;;  %v3849_v17 = vld [vmem:[#allocation4 + $0x88] sm:$0xf0] }
  0x5a   :  { %943 = vmatpush.bf16.msrb.mxu3 %v2987_v30 }
  0xb5   :  { %v4310_v9 = vpop.f32.mrf.mxu0 }
  0xb6   :  { %v304_v14 = vrot.slane %v4310_v9, 4  ;;  %v4313_v15 = vpop.f32.mrf.mxu1 }
  0xb7   :  { %v310_v21 = vrot.slane %v4313_v15, 4 }
  0xb8   :  { %v305_v23 = vadd.f32 %v304_v14, %v4310_v9 }
  0xb9   :  { %v311_v27 = vadd.f32 %v310_v21, %v4313_v15 }
  0xba   :  { %v306_v32 = vrot.slane %v305_v23, 2 }
  0xbb   :  { %v312_v38 = vrot.slane %v311_v27, 2 }
  0xbc   :  { %v307_v40 = vadd.f32 %v306_v32, %v305_v23  ;;  %v3039_v23 = vor.u32 %v3879_v19, %v3038_v18  ;;  %v3116_v32 = vld [vmem:[#allocation4 + $0x21c] sm:$0xf0]  ;;  %v2919_v19 = vor.u32 %v3849_v17, %v2918_v16 }
  0xbd   :  { %v4321_v41 = vpop.f32.mrf.mxu2  ;;  %v313_v46 = vadd.f32 %v312_v38, %v311_v27  ;;  %v276_v48 = vpop.f32.mrf.mxu0  ;;  %v3119_v33 = vor.u32 %v3898_v31, %v3116_v32  ;;  %v3027_v38 = vor.u32 %v3876_v35, %v3026_v34  ;;  %v2990_v31 = vld [vmem:[#allocation4 + $0x110] sm:$0xf]  ;;  %v3867_v32 = vld [vmem:[#allocation4 + $0x118] sm:$0xf0]  ;;  %v2906_v35 = vld [vmem:[#allocation4 + $0x68] sm:$0xf] }
  0xbe   :  { %v316_v47 = vrot.slane %v4321_v41, 4  ;;  %v308_v52 = vrot.slane %v307_v40, 1  ;;  %v289_v53 = vpop.f32.mrf.mxu1  ;;  %978 = vmatpush.bf16.msra.mxu2 %v3039_v23  ;;  %v2972_v48 = vld [vmem:[#allocation4 + $0xfc] sm:$0xf0]  ;;  %v2991_v34 = vor.u32 %v3867_v32, %v2990_v31 }
  0xbf   :  { %v314_v58 = vrot.slane %v313_v46, 1  ;;  %953 = vmatpush.bf16.msra.mxu0 %v3119_v33  ;;  %v3104_v53 = vld [vmem:[#allocation4 + $0x204] sm:$0xf0] }
  0xc0   :  { %v317_v59 = vadd.f32 %v316_v47, %v4321_v41  ;;  %v309_v62 = vadd.f32 %v308_v52, %v307_v40  ;;  %v2942_v40 = vld [vmem:[#allocation4 + $0xb0] sm:$0xf]  ;;  %v3862_v47 = vld [vmem:[#allocation4 + $0xf4] sm:$0xf]  ;;  %v3895_v52 = vld [vmem:[#allocation4 + $0x1fc] sm:$0xf] }
  0xc1   :  { %v315_v3 = vadd.f32 %v314_v58, %v313_v46  ;;  %v2943_v46 = vor.u32 %v3855_v43, %v2942_v40  ;;  %v2975_v51 = vor.u32 %v3862_v47, %v2972_v48  ;;  %v3107_v55 = vor.u32 %v3895_v52, %v3104_v53  ;;  %v3873_v58 = vld [vmem:[#allocation4 + $0x148] sm:$0xf0]  ;;  %v3843_v52 = vld [vmem:[#allocation4 + $0x58] sm:$0xf0] }
  0xc2   :  { %v318_v4 = vrot.slane %v317_v59, 2  ;;  %v329_v42 = vmul.f32 %v4327_v57, %v309_v62  ;;  %979 = vmatpush.bf16.msra.mxu2 %v3027_v38  ;;  %v3015_v61 = vor.u32 %v3873_v58, %v3014_v56  ;;  %v2930_v62 = vld [vmem:[#allocation4 + $0x98] sm:$0xf]  ;;  %v3068_v38 = vld [vmem:[#allocation4 + $0x1bc] sm:$0xf0] }
  0xc3   :  { %v330_v13 = vmul.f32 %v4327_v57, %v315_v3  ;;  %965 = vmatpush.bf16.msra.mxu1 %v2943_v46  ;;  %v2931_v1 = vor.u32 %v3852_v63, %v2930_v62  ;;  %v2960_v3 = vld [vmem:[#allocation4 + $0xe4] sm:$0xf0]  ;;  %944 = vmatpush.bf16.msrb.mxu3 %v2975_v51  ;;  %v2894_v51 = vld [vmem:[#allocation4 + $0x50] sm:$0xf]  ;;  %v3883_v58 = vld [vmem:[#allocation4 + $0x19c] sm:$0xf] }
  0xc4   :  { %v319_v14 = vadd.f32 %v318_v4, %v317_v59  ;;  %v4333_v21 = vsub.f32 %v4310_v9, %v329_v42  ;;  %954 = vmatpush.bf16.msra.mxu0 %v3107_v55  ;;  %v2963_v6 = vor.u32 %v3859_v2, %v2960_v3  ;;  %v3092_v42 = vld [vmem:[#allocation4 + $0x1ec] sm:$0xf0]  ;;  %v2966_v62 = vld [vmem:[#allocation4 + $0xe0] sm:$0xf]  ;;  %v3861_v63 = vld [vmem:[#allocation4 + $0xe8] sm:$0xf0] }
  0xc5   :  { %v302_v22 = vpop.f32.mrf.mxu2  ;;  %v4336_v27 = vsub.f32 %v4313_v15, %v330_v13  ;;  %v3095_v8 = vor.u32 %v3892_v7, %v3092_v42  ;;  %v2882_v2 = vld [vmem:[#allocation4 + $0x38] sm:$0xf]  ;;  %v3840_v3 = vld [vmem:[#allocation4 + $0x40] sm:$0xf0]  ;;  %v2954_v7 = vld [vmem:[#allocation4 + $0xc8] sm:$0xf] }
  0xc6   :  { %v320_v28 = vrot.slane %v319_v14, 1  ;;  %v335_v9 = vmul.f32 %v4333_v21, %v4333_v21  ;;  %980 = vmatpush.bf16.msra.mxu2 %v3015_v61  ;;  %v2948_v22 = vld [vmem:[#allocation4 + $0xcc] sm:$0xf0] }
  0xc7   :  { %v336_v37 = vmul.f32 %v4336_v27, %v4336_v27  ;;  %966 = vmatpush.bf16.msra.mxu1 %v2931_v1  ;;  %945 = vmatpush.bf16.msrb.mxu3 %v2963_v6  ;;  %v2951_v25 = vor.u32 %v3856_v20, %v2948_v22  ;;  %v2967_v1 = vor.u32 %v3861_v63, %v2966_v62  ;;  %v3044_v6 = vld [vmem:[#allocation4 + $0x18c] sm:$0xf0]  ;;  %v2858_v22 = vld [vmem:[#allocation4 + $0x8] sm:$0xf] }
  0xc8   :  { %v321_v15 = vadd.f32 %v320_v28, %v319_v14  ;;  %v338_v44 = vrot.slane %v335_v9, 4  ;;  %v3003_v14 = vor.u32 %v3870_v11, %v3002_v10  ;;  %955 = vmatpush.bf16.msra.mxu0 %v3095_v8  ;;  %v3080_v28 = vld [vmem:[#allocation4 + $0x1d4] sm:$0xf0]  ;;  %v3858_v8 = vld [vmem:[#allocation4 + $0xd0] sm:$0xf0] }
  0xc9   :  { %v344_v49 = vrot.slane %v336_v37, 4  ;;  %v3083_v30 = vor.u32 %v3889_v26, %v3080_v28  ;;  %v2955_v10 = vor.u32 %v3858_v8, %v2954_v7  ;;  %v3086_v63 = vld [vmem:[#allocation4 + $0x1d0] sm:$0xf]  ;;  %v3050_v7 = vld [vmem:[#allocation4 + $0x188] sm:$0xf] }
  0xca   :  { %v331_v50 = vmul.f32 %v4327_v57, %v321_v15  ;;  %v339_v54 = vadd.f32 %v338_v44, %v335_v9  ;;  %981 = vmatpush.bf16.msra.mxu2 %v3003_v14  ;;  %v3886_v15 = vld [vmem:[#allocation4 + $0x1b4] sm:$0xf]  ;;  %v2978_v44 = vld [vmem:[#allocation4 + $0xf8] sm:$0xf]  ;;  %v3222_v8 = vld [vmem:[#allocation6 + $0xa8] sm:$0xf] }
  0xcb   :  { %v345_v59 = vadd.f32 %v344_v49, %v336_v37  ;;  %967 = vmatpush.bf16.msra.mxu1 %v2919_v19  ;;  %v3846_v37 = vld [vmem:[#allocation4 + $0x70] sm:$0xf0]  ;;  %946 = vmatpush.bf16.msrb.mxu3 %v2951_v25  ;;  %v3071_v47 = vor.u32 %v3886_v15, %v3068_v38  ;;  %v2979_v48 = vor.u32 %v3864_v45, %v2978_v44  ;;  %v3134_v38 = vld [vmem:[#allocation4 + $0x230] sm:$0xf] }
  0xcc   :  { %v4344_v60 = vsub.f32 %v4321_v41, %v331_v50  ;;  %v340_v0 = vrot.slane %v339_v54, 2  ;;  %956 = vmatpush.bf16.msra.mxu0 %v3083_v30  ;;  %v2907_v43 = vor.u32 %v3846_v37, %v2906_v35 }
  0xcd   :  { %v346_v4 = vrot.slane %v345_v59, 2 }
  0xce   :  { %v337_v5 = vmul.f32 %v4344_v60, %v4344_v60  ;;  %v341_v41 = vadd.f32 %v340_v0, %v339_v54  ;;  %982 = vmatpush.bf16.msra.mxu2 %v2991_v34  ;;  %v2895_v54 = vor.u32 %v3843_v52, %v2894_v51 }
  0xcf   :  { %v347_v12 = vadd.f32 %v346_v4, %v345_v59  ;;  %968 = vmatpush.bf16.msra.mxu1 %v2907_v43  ;;  %v3056_v59 = vld [vmem:[#allocation4 + $0x1a4] sm:$0xf0]  ;;  %v2883_v4 = vor.u32 %v3840_v3, %v2882_v2  ;;  %v3888_v2 = vld [vmem:[#allocation4 + $0x1c0] sm:$0xf0] }
  0xd0   :  { %v350_v13 = vrot.slane %v337_v5, 4  ;;  %v342_v18 = vrot.slane %v341_v41, 1  ;;  %957 = vmatpush.bf16.msra.mxu0 %v3071_v47  ;;  %v3059_v61 = vor.u32 %v3883_v58, %v3056_v59  ;;  %v3098_v59 = vld [vmem:[#allocation4 + $0x1e8] sm:$0xf] }
  0xd1   :  { %v348_v23 = vrot.slane %v347_v12, 1 }
  0xd2   :  { %v351_v24 = vadd.f32 %v350_v13, %v337_v5  ;;  %v343_v29 = vadd.f32 %v342_v18, %v341_v41  ;;  %983 = vmatpush.bf16.msra.mxu2 %v2979_v48  ;;  %v3880_v5 = vld [vmem:[#allocation4 + $0x184] sm:$0xf]  ;;  %v3837_v13 = vld [vmem:[#allocation4 + $0x28] sm:$0xf0] }
  0xd3   :  { %v349_v9 = vadd.f32 %v348_v23, %v347_v12  ;;  %969 = vmatpush.bf16.msra.mxu1 %v2895_v54  ;;  %v3047_v41 = vor.u32 %v3880_v5, %v3044_v6  ;;  %v2870_v12 = vld [vmem:[#allocation4 + $0x20] sm:$0xf]  ;;  %v3834_v23 = vld [vmem:[#allocation4 + $0x10] sm:$0xf0]  ;;  %v3897_v54 = vld [vmem:[#allocation4 + $0x208] sm:$0xf0] }
  0xd4   :  { %v352_v33 = vrot.slane %v351_v24, 2  ;;  %v356_v36 = vmul.f32 %v343_v29, %v4327_v57  ;;  %958 = vmatpush.bf16.msra.mxu0 %v3059_v61  ;;  %v2871_v16 = vor.u32 %v3837_v13, %v2870_v12  ;;  %v2859_v25 = vor.u32 %v3834_v23, %v2858_v22  ;;  %v3894_v61 = vld [vmem:[#allocation4 + $0x1f0] sm:$0xf0]  ;;  %v3885_v5 = vld [vmem:[#allocation4 + $0x1a8] sm:$0xf0] }
  0xd5   :  { %v357_v39 = vmul.f32 %v349_v9, %v4327_v57  ;;  %v3099_v62 = vor.u32 %v3894_v61, %v3098_v59  ;;  %v3210_v12 = vld [vmem:[#allocation6 + $0x90] sm:$0xf]  ;;  %v3923_v13 = vld [vmem:[#allocation6 + $0x98] sm:$0xf0]  ;;  %v3925_v23 = vld [vmem:[#allocation6 + $0xac] sm:$0xf] }
  0xd6   :  { %v353_v40 = vadd.f32 %v352_v33, %v351_v24  ;;  %v359_v46 = vmax.f32 %v356_v36, 0.0  ;;  %984 = vmatpush.bf16.msra.mxu2 %v2967_v1  ;;  %v3074_v1 = vld [vmem:[#allocation4 + $0x1b8] sm:$0xf]  ;;  %v3949_v59 = vld [vmem:[#allocation6 + $0x16c] sm:$0xf] }
  0xd7   :  { %v360_v49 = vmax.f32 %v357_v39, 0.0  ;;  %970 = vmatpush.bf16.msra.mxu1 %v2883_v4  ;;  %v3903_v39 = vld [vmem:[#allocation4 + $0x238] sm:$0xf0]  ;;  %v3075_v3 = vor.u32 %v3888_v2, %v3074_v1  ;;  %v3062_v4 = vld [vmem:[#allocation4 + $0x1a0] sm:$0xf] }
  0xd8   :  { %v354_v50 = vrot.slane %v353_v40, 1  ;;  %v362_v53 = vadd.f32 1e-05, %v359_v46  ;;  %959 = vmatpush.bf16.msra.mxu0 %v3047_v41  ;;  %v3135_v46 = vor.u32 %v3903_v39, %v3134_v38  ;;  %v3063_v6 = vor.u32 %v3885_v5, %v3062_v4  ;;  %v3150_v38 = vld [vmem:[#allocation6 + $0x18] sm:$0xf] }
  0xd9   :  { %v363_v55 = vadd.f32 1e-05, %v360_v49  ;;  %v3122_v49 = vld [vmem:[#allocation4 + $0x218] sm:$0xf]  ;;  %v3908_v39 = vld [vmem:[#allocation6 + $0x20] sm:$0xf0] }
  0xda   :  { %v355_v56 = vadd.f32 %v354_v50, %v353_v40  ;;  %4085 = vrsqrt.f32 %v362_v53  ;;  %985 = vmatpush.bf16.msra.mxu2 %v2955_v10  ;;  %vm371_vm3 = vweird.f32 %v362_v53  ;;  %v3926_v10 = vld [vmem:[#allocation6 + $0xb0] sm:$0xf0]  ;;  %v3320_v61 = vld [vmem:[#allocation6 + $0x174] sm:$0xf0]  ;;  %v3306_v1 = vld [vmem:[#allocation6 + $0x150] sm:$0xf] }
  0xdb   :  { %4087 = vrsqrt.f32 %v363_v55  ;;  %971 = vmatpush.bf16.msra.mxu1 %v2871_v16  ;;  %vm381_vm5 = vweird.f32 %v363_v55  ;;  %v3198_v16 = vld [vmem:[#allocation6 + $0x78] sm:$0xf]  ;;  %v3947_v2 = vld [vmem:[#allocation6 + $0x158] sm:$0xf0] }
  0xdc   :  { %v358_v0 = vmul.f32 %v355_v56, %v4327_v57 }
  0xde   :  { %v361_v42 = vmax.f32 %v358_v0, 0.0 }
  0xdf   :  { %972 = vmatpush.bf16.msra.mxu1 %v2859_v25 }
  0xe0   :  { %v364_v11 = vadd.f32 1e-05, %v361_v42  ;;  %v4086_v14 = vpop.eup %4085  ;;  %v3882_v42 = vld [vmem:[#allocation4 + $0x190] sm:$0xf0] }
  0xe1   :  { %v4088_v17 = vpop.eup %4087  ;;  %v366_v18 = vmul.f32 %v4086_v14, %v362_v53  ;;  %vm372_vm1 = vweird.f32 %v4086_v14  ;;  %v3110_v53 = vld [vmem:[#allocation4 + $0x200] sm:$0xf]  ;;  %v3051_v41 = vor.u32 %v3882_v42, %v3050_v7  ;;  %v3946_v42 = vld [vmem:[#allocation6 + $0x154] sm:$0xf] }
  0xe2   :  { %4089 = vrsqrt.f32 %v364_v11  ;;  %v376_v19 = vmul.f32 %v4088_v17, %v363_v55  ;;  %vm382_vm2 = vweird.f32 %v4088_v17  ;;  %vm373_vm4 = vmor %vm371_vm3, %vm372_vm1  ;;  %vm391_vm8 = vweird.f32 %v364_v11  ;;  %v3164_v7 = vld [vmem:[#allocation6 + $0x3c] sm:$0xf0] }
  0xe3   :  { %v367_v20 = vmul.f32 %v4086_v14, %v366_v18  ;;  %vm383_vm6 = vmor %vm381_vm5, %vm382_vm2  ;;  %v3111_v58 = vor.u32 %v3897_v54, %v3110_v53  ;;  %v3318_v53 = vld [vmem:[#allocation6 + $0x168] sm:$0xf]  ;;  %v3950_v54 = vld [vmem:[#allocation6 + $0x170] sm:$0xf0] }
  0xe4   :  { %v377_v24 = vmul.f32 %v4088_v17, %v376_v19  ;;  %v3186_v19 = vld [vmem:[#allocation6 + $0x60] sm:$0xf] }
  0xe5   :  { %v368_v26 = vmul.f32 0.5, %v367_v20  ;;  %v3917_v20 = vld [vmem:[#allocation6 + $0x68] sm:$0xf0] }
  0xe6   :  { %v378_v28 = vmul.f32 0.5, %v377_v24  ;;  %v3187_v22 = vor.u32 %v3917_v20, %v3186_v19  ;;  %v3224_v24 = vld [vmem:[#allocation6 + $0xb4] sm:$0xf0]  ;;  %v3152_v20 = vld [vmem:[#allocation6 + $0x24] sm:$0xf0] }
  0xe7   :  { %v369_v30 = vsub.f32 1.5, %v368_v26  ;;  %v3227_v25 = vor.u32 %v3925_v23, %v3224_v24  ;;  %v3174_v26 = vld [vmem:[#allocation6 + $0x48] sm:$0xf] }
  0xe8   :  { %v4090_v29 = vpop.eup %4089  ;;  %v379_v31 = vsub.f32 1.5, %v378_v28  ;;  %v3914_v28 = vld [vmem:[#allocation6 + $0x50] sm:$0xf0]  ;;  %v3296_v23 = vld [vmem:[#allocation6 + $0x144] sm:$0xf0] }
  0xe9   :  { %v386_v32 = vmul.f32 %v4090_v29, %v364_v11  ;;  %v370_v9 = vmul.f32 %v4086_v14, %v369_v30  ;;  %vm392_vm7 = vweird.f32 %v4090_v29  ;;  %v3223_v11 = vor.u32 %v3926_v10, %v3222_v8  ;;  %v3922_v30 = vld [vmem:[#allocation6 + $0x94] sm:$0xf] }
  0xea   :  { %v380_v33 = vmul.f32 %v4088_v17, %v379_v31  ;;  %vm393_vm9 = vmor %vm391_vm8, %vm392_vm7  ;;  %v3212_v31 = vld [vmem:[#allocation6 + $0x9c] sm:$0xf0] }
  0xeb   :  { %v387_v34 = vmul.f32 %v4090_v29, %v386_v32  ;;  %v374_v35 = vsel %vm373_vm4, %v4086_v14, %v370_v9  ;;  %v3211_v14 = vor.u32 %v3923_v13, %v3210_v12  ;;  %v3215_v32 = vor.u32 %v3922_v30, %v3212_v31  ;;  %v3162_v9 = vld [vmem:[#allocation6 + $0x30] sm:$0xf]  ;;  %v3941_v30 = vld [vmem:[#allocation6 + $0x128] sm:$0xf0]  ;;  %v3904_v31 = vld [vmem:[#allocation6 + $0x4] sm:$0xf] }
  0xec   :  { %v395_v36 = vmul.f32 %v374_v35, %v4333_v21  ;;  %v384_v37 = vsel %vm383_vm6, %v4088_v17, %v380_v33  ;;  %v3900_v21 = vld [vmem:[#allocation4 + $0x220] sm:$0xf0]  ;;  %v3911_v33 = vld [vmem:[#allocation6 + $0x38] sm:$0xf0] }
  0xed   :  { %v388_v15 = vmul.f32 0.5, %v387_v34  ;;  %v396_v40 = vmul.f32 %v384_v37, %v4336_v27  ;;  %v3123_v52 = vor.u32 %v3900_v21, %v3122_v49  ;;  %v3920_v17 = vld [vmem:[#allocation6 + $0x80] sm:$0xf0]  ;;  %v3163_v35 = vor.u32 %v3911_v33, %v3162_v9  ;;  %v3200_v37 = vld [vmem:[#allocation6 + $0x84] sm:$0xf0] }
  0xee   :  { %v398_v44 = vmax.f32 %v395_v36, 0.0  ;;  %v3199_v18 = vor.u32 %v3920_v17, %v3198_v16  ;;  %v3919_v36 = vld [vmem:[#allocation6 + $0x7c] sm:$0xf]  ;;  %v3138_v21 = vld [vmem:[#allocation6] sm:$0xf] }
  0xef   :  { %v389_v43 = vsub.f32 1.5, %v388_v15  ;;  %v399_v45 = vmax.f32 %v396_v40, 0.0  ;;  %v3203_v15 = vor.u32 %v3919_v36, %v3200_v37  ;;  %v3151_v40 = vor.u32 %v3908_v39, %v3150_v38  ;;  %v3294_v16 = vld [vmem:[#allocation6 + $0x138] sm:$0xf]  ;;  %v3944_v17 = vld [vmem:[#allocation6 + $0x140] sm:$0xf0] }
  0xf0   :  { %401 = vst [vmem:[%s4542_s7] sm:$0xff] %v398_v44  ;;  %v404_v48 = vpack.c.bf16 %v398_v44, %v398_v44  ;;  %v3188_v44 = vld [vmem:[#allocation6 + $0x6c] sm:$0xf0]  ;;  %v3295_v19 = vor.u32 %v3944_v17, %v3294_v16  ;;  %v3390_v16 = vld [vmem:[#allocation6 + $0x1f8] sm:$0xf] }
  0xf1   :  { %v390_v47 = vmul.f32 %v4090_v29, %v389_v43  ;;  %402 = vst [vmem:[%s4542_s7 + $0x8] sm:$0xff] %v399_v45  ;;  %v405_v27 = vpack.c.bf16 %v399_v45, %v399_v45  ;;  %v3916_v43 = vld [vmem:[#allocation6 + $0x64] sm:$0xf]  ;;  %v3284_v36 = vld [vmem:[#allocation6 + $0x12c] sm:$0xf0] }
  0xf2   :  { %895 = vmatmul.bf16.vlgmr.msra.gmra.mxu3 %v404_v48  ;;  %934 = vmatmul.bf16.vlgmr.msrb.gmra.mxu2 %v404_v48 }
  0xf3   :  { %v394_v50 = vsel %vm393_vm9, %v4090_v29, %v390_v47  ;;  %908 = vmatmul.bf16.vlgmr.msrb.gmra.mxu0 %v405_v27  ;;  %991 = vmatpush.bf16.msra.mxu3 %v3135_v46  ;;  %v3175_v29 = vor.u32 %v3914_v28, %v3174_v26  ;;  %v3191_v47 = vor.u32 %v3916_v43, %v3188_v44  ;;  %v3326_v43 = vld [vmem:[#allocation6 + $0x170] sm:$0xf]  ;;  %v3951_v44 = vld [vmem:[#allocation6 + $0x178] sm:$0xf0] }
  0xf4   :  { %v397_v51 = vmul.f32 %v394_v50, %v4344_v60  ;;  %v3891_v60 = vld [vmem:[#allocation4 + $0x1d8] sm:$0xf0]  ;;  %1580 = vmatpush.bf16.msrb.mxu0 %v3223_v11 }
  0xf5   :  { %v3087_v0 = vor.u32 %v3891_v60, %v3086_v63  ;;  %v3323_v60 = vor.u32 %v3949_v59, %v3320_v61 }
  0xf6   :  { %v400_v55 = vmax.f32 %v397_v51, 0.0 }
  0xf7   :  { %992 = vmatpush.bf16.msra.mxu3 %v3123_v52 }
  0xf8   :  { %403 = vst [vmem:[%s4542_s7 + $0x10] sm:$0xff] %v400_v55  ;;  %v406_v56 = vpack.c.bf16 %v400_v55, %v400_v55  ;;  %1581 = vmatpush.bf16.msrb.mxu0 %v3211_v14  ;;  %v3913_v55 = vld [vmem:[#allocation6 + $0x4c] sm:$0xf] }
  0xfa   :  { %921 = vmatmul.bf16.vlgmr.msrb.gmra.mxu1 %v406_v56 }
  0xfb   :  { %993 = vmatpush.bf16.msra.mxu3 %v3111_v58  ;;  %v3176_v58 = vld [vmem:[#allocation6 + $0x54] sm:$0xf0] }
  0xfc   :  { %1582 = vmatpush.bf16.msrb.mxu0 %v3199_v18  ;;  %v3179_v63 = vor.u32 %v3913_v55, %v3176_v58  ;;  %v3907_v18 = vld [vmem:[#allocation6 + $0x1c] sm:$0xf]  ;;  %v3272_v55 = vld [vmem:[#allocation6 + $0x114] sm:$0xf0]  ;;  %v3948_v58 = vld [vmem:[#allocation6 + $0x160] sm:$0xf0] }
  0xff   :  { %994 = vmatpush.bf16.msra.mxu3 %v3099_v62 }
 0x100   :  { %1583 = vmatpush.bf16.msrb.mxu0 %v3187_v22  ;;  %v3943_v22 = vld [vmem:[#allocation6 + $0x13c] sm:$0xf] }
 0x101   :  { %v3299_v26 = vor.u32 %v3943_v22, %v3296_v23  ;;  %v3246_v23 = vld [vmem:[#allocation6 + $0xd8] sm:$0xf] }
 0x102   :  { %947 = vmatmul.bf16.vlgmr.msrb.gmra.mxu3 %v405_v27  ;;  %986 = vmatmul.bf16.vlgmr.msra.gmra.mxu2 %v405_v27  ;;  %v3905_v27 = vld [vmem:[#allocation6 + $0x8] sm:$0xf0] }
 0x103   :  { %960 = vmatmul.bf16.vlgmr.msra.gmra.mxu0 %v406_v56  ;;  %995 = vmatpush.bf16.msra.mxu3 %v3087_v0  ;;  %v3139_v52 = vor.u32 %v3905_v27, %v3138_v21 }
 0x104   :  { %1584 = vmatpush.bf16.msrb.mxu0 %v3175_v29  ;;  %v3282_v29 = vld [vmem:[#allocation6 + $0x120] sm:$0xf] }
 0x105   :  { %v3283_v33 = vor.u32 %v3941_v30, %v3282_v29  ;;  %v3290_v29 = vld [vmem:[#allocation6 + $0x128] sm:$0xf] }
 0x107   :  { %996 = vmatpush.bf16.msra.mxu3 %v3075_v3  ;;  %v3910_v3 = vld [vmem:[#allocation6 + $0x34] sm:$0xf] }
 0x108   :  { %1585 = vmatpush.bf16.msrb.mxu0 %v3163_v35  ;;  %v3167_v11 = vor.u32 %v3910_v3, %v3164_v7  ;;  %v3940_v35 = vld [vmem:[#allocation6 + $0x124] sm:$0xf]  ;;  %v3258_v3 = vld [vmem:[#allocation6 + $0xf0] sm:$0xf] }
 0x10a   :  { %973 = vmatmul.bf16.vlgmr.msra.gmra.mxu1 %v404_v48 }
 0x10b   :  { %997 = vmatpush.bf16.msra.mxu3 %v3063_v6  ;;  %v3307_v6 = vor.u32 %v3947_v2, %v3306_v1 }
 0x10c   :  { %1586 = vmatpush.bf16.msrb.mxu0 %v3151_v40  ;;  %v3287_v40 = vor.u32 %v3940_v35, %v3284_v36  ;;  %v3965_v36 = vld [vmem:[#allocation6 + $0x1e8] sm:$0xf0] }
 0x10f   :  { %998 = vmatpush.bf16.msra.mxu3 %v3051_v41  ;;  %v3308_v41 = vld [vmem:[#allocation6 + $0x15c] sm:$0xf0] }
 0x110   :  { %1587 = vmatpush.bf16.msrb.mxu0 %v3139_v52  ;;  %v3311_v12 = vor.u32 %v3946_v42, %v3308_v41  ;;  %v3938_v52 = vld [vmem:[#allocation6 + $0x110] sm:$0xf0]  ;;  %v3260_v41 = vld [vmem:[#allocation6 + $0xfc] sm:$0xf0] }
 0x111   :  { %v3934_v42 = vld [vmem:[#allocation6 + $0xf4] sm:$0xf] }
 0x112   :  { %999 = vmatmul.bf16.vlgmr.msra.gmra.mxu3 %v406_v56  ;;  %v3319_v56 = vor.u32 %v3950_v54, %v3318_v53  ;;  %v3937_v53 = vld [vmem:[#allocation6 + $0x10c] sm:$0xf] }
 0x113   :  { %1619 = vmatpush.bf16.msrb.mxu3 %v3227_v25  ;;  %v3155_v25 = vor.u32 %v3907_v18, %v3152_v20  ;;  %v3275_v61 = vor.u32 %v3937_v53, %v3272_v55  ;;  %v3968_v18 = vld [vmem:[#allocation6 + $0x200] sm:$0xf0]  ;;  %v3416_v55 = vld [vmem:[#allocation6 + $0x234] sm:$0xf0] }
 0x114   :  { %1593 = vmatpush.bf16.msrb.mxu1 %v3319_v56  ;;  %1632 = vmatpush.bf16.msra.mxu0 %v3323_v60  ;;  %v3314_v56 = vld [vmem:[#allocation6 + $0x158] sm:$0xf]  ;;  %v3971_v60 = vld [vmem:[#allocation6 + $0x218] sm:$0xf0]  ;;  %v3391_v22 = vor.u32 %v3968_v18, %v3390_v16  ;;  %v3392_v16 = vld [vmem:[#allocation6 + $0x204] sm:$0xf0] }
 0x117   :  { %1620 = vmatpush.bf16.msrb.mxu3 %v3215_v32 }
 0x118   :  { %1594 = vmatpush.bf16.msrb.mxu1 %v3307_v6  ;;  %1633 = vmatpush.bf16.msra.mxu0 %v3311_v12 }
 0x11b   :  { %1621 = vmatpush.bf16.msrb.mxu3 %v3203_v15 }
 0x11c   :  { %1595 = vmatpush.bf16.msrb.mxu1 %v3295_v19  ;;  %1634 = vmatpush.bf16.msra.mxu0 %v3299_v26  ;;  %v3931_v26 = vld [vmem:[#allocation6 + $0xdc] sm:$0xf] }
 0x11f   :  { %1622 = vmatpush.bf16.msrb.mxu3 %v3191_v47  ;;  %v3327_v47 = vor.u32 %v3951_v44, %v3326_v43  ;;  %v3234_v43 = vld [vmem:[#allocation6 + $0xc0] sm:$0xf]  ;;  %v3929_v44 = vld [vmem:[#allocation6 + $0xc8] sm:$0xf0] }
 0x120   :  { %1596 = vmatpush.bf16.msrb.mxu1 %v3283_v33  ;;  %1635 = vmatpush.bf16.msra.mxu0 %v3287_v40  ;;  %v3942_v33 = vld [vmem:[#allocation6 + $0x130] sm:$0xf0] }
 0x121   :  { %v3291_v35 = vor.u32 %v3942_v33, %v3290_v29 }
 0x123   :  { %1623 = vmatpush.bf16.msrb.mxu3 %v3179_v63  ;;  %v3402_v63 = vld [vmem:[#allocation6 + $0x210] sm:$0xf] }
 0x124   :  { %1636 = vmatpush.bf16.msra.mxu0 %v3275_v61 }
 0x127   :  { %1624 = vmatpush.bf16.msrb.mxu3 %v3167_v11 }
 0x12b   :  { %1625 = vmatpush.bf16.msrb.mxu3 %v3155_v25 }
 0x170   :  { %v909_v34 = vpop.f32.mrf.mxu0 }
 0x175   :  { %v896_v45 = vpop.f32.mrf.mxu3  ;;  %v4363_v46 = vpop.f32.mrf.mxu2 }
 0x176   :  { %v910_v48 = vadd.f32 %v909_v34, %v896_v45  ;;  %v3140_v34 = vld [vmem:[#allocation6 + $0xc] sm:$0xf0]  ;;  %v3414_v45 = vld [vmem:[#allocation6 + $0x228] sm:$0xf] }
 0x177   :  { %v922_v49 = vpop.f32.mrf.mxu1  ;;  %v3143_v39 = vor.u32 %v3904_v31, %v3140_v34  ;;  %v3378_v34 = vld [vmem:[#allocation6 + $0x1e0] sm:$0xf] }
 0x178   :  { %v4365_v50 = vadd.f32 %v922_v49, %v910_v48  ;;  %v911_v51 = vpop.f32.mrf.mxu0  ;;  %v3974_v48 = vld [vmem:[#allocation6 + $0x230] sm:$0xf0]  ;;  %v3379_v40 = vor.u32 %v3965_v36, %v3378_v34 }
 0x179   :  { %1626 = vmatpush.bf16.msrb.mxu3 %v3143_v39  ;;  %v3415_v51 = vor.u32 %v3974_v48, %v3414_v45  ;;  %v3928_v48 = vld [vmem:[#allocation6 + $0xc4] sm:$0xf]  ;;  %v3930_v36 = vld [vmem:[#allocation6 + $0xd0] sm:$0xf0] }
 0x17a   :  { %v1004_v62 = vrot.slane %v4365_v50, 4 }
 0x17b   :  { %1606 = vmatpush.bf16.msrb.mxu2 %v3415_v51  ;;  %v3973_v51 = vld [vmem:[#allocation6 + $0x22c] sm:$0xf] }
 0x17c   :  { %v1005_v0 = vadd.f32 %v1004_v62, %v4365_v50  ;;  %v3315_v62 = vor.u32 %v3948_v58, %v3314_v56  ;;  %v3278_v56 = vld [vmem:[#allocation6 + $0x110] sm:$0xf] }
 0x17d   :  { %v898_v4 = vpop.f32.mrf.mxu3  ;;  %v937_v5 = vpop.f32.mrf.mxu2  ;;  %1671 = vmatpush.bf16.msra.mxu3 %v3327_v47  ;;  %v3235_v47 = vor.u32 %v3929_v44, %v3234_v43 }
 0x17e   :  { %v1006_v8 = vrot.slane %v1005_v0, 2  ;;  %v3935_v4 = vld [vmem:[#allocation6 + $0xf8] sm:$0xf0] }
 0x17f   :  { %v924_v10 = vpop.f32.mrf.mxu1  ;;  %v3259_v7 = vor.u32 %v3935_v4, %v3258_v3 }
 0x180   :  { %v1007_v13 = vadd.f32 %v1006_v8, %v1005_v0  ;;  %v961_v14 = vpop.f32.mrf.mxu0  ;;  %v3403_v0 = vor.u32 %v3971_v60, %v3402_v63  ;;  %v3302_v8 = vld [vmem:[#allocation6 + $0x140] sm:$0xf]  ;;  %v3962_v63 = vld [vmem:[#allocation6 + $0x1d0] sm:$0xf0] }
 0x181   :  { %1672 = vmatpush.bf16.msra.mxu3 %v3315_v62 }
 0x182   :  { %v1008_v24 = vrot.slane %v1007_v13, 1  ;;  %1607 = vmatpush.bf16.msrb.mxu2 %v3403_v0  ;;  %v3970_v0 = vld [vmem:[#allocation6 + $0x214] sm:$0xf] }
 0x184   :  { %v1009_v28 = vadd.f32 %v1008_v24, %v1007_v13  ;;  %v3263_v13 = vor.u32 %v3934_v42, %v3260_v41  ;;  %v3932_v24 = vld [vmem:[#allocation6 + $0xe0] sm:$0xf0]  ;;  %v3354_v42 = vld [vmem:[#allocation6 + $0x1b0] sm:$0xf]  ;;  %v3959_v41 = vld [vmem:[#allocation6 + $0x1b8] sm:$0xf0] }
 0x185   :  { %v948_v32 = vpop.f32.mrf.mxu3  ;;  %v4369_v9 = vpop.f32.mrf.mxu2  ;;  %v3247_v25 = vor.u32 %v3932_v24, %v3246_v23  ;;  %v3342_v24 = vld [vmem:[#allocation6 + $0x198] sm:$0xf] }
 0x186   :  { %v1022_v37 = vmul.f32 %v1009_v28, %v4327_v57  ;;  %v949_v15 = vadd.f32 %v948_v32, %v4363_v46  ;;  %v3270_v46 = vld [vmem:[#allocation6 + $0x108] sm:$0xf]  ;;  %1637 = vmatpush.bf16.msra.mxu0 %v3263_v13  ;;  %1608 = vmatpush.bf16.msrb.mxu2 %v3391_v22  ;;  %v3355_v13 = vor.u32 %v3959_v41, %v3354_v42  ;;  %v3955_v41 = vld [vmem:[#allocation6 + $0x19c] sm:$0xf] }
 0x187   :  { %v4373_v38 = vpop.f32.mrf.mxu1  ;;  %v3271_v54 = vor.u32 %v3938_v52, %v3270_v46  ;;  %v3248_v28 = vld [vmem:[#allocation6 + $0xe4] sm:$0xf0] }
 0x188   :  { %v4376_v49 = vsub.f32 %v4365_v50, %v1022_v37  ;;  %v4378_v21 = vadd.f32 %v961_v14, %v949_v15  ;;  %v963_v27 = vpop.f32.mrf.mxu0  ;;  %v3945_v14 = vld [vmem:[#allocation6 + $0x148] sm:$0xf0]  ;;  %v3251_v32 = vor.u32 %v3931_v26, %v3248_v28  ;;  %v988_v39 = vadd.f32 %v4369_v9, %v4373_v38  ;;  %v3939_v9 = vld [vmem:[#allocation6 + $0x118] sm:$0xf0] }
 0x189   :  { %1597 = vmatpush.bf16.msrb.mxu1 %v3271_v54  ;;  %v3303_v17 = vor.u32 %v3945_v14, %v3302_v8  ;;  %v3236_v27 = vld [vmem:[#allocation6 + $0xcc] sm:$0xf0]  ;;  %v3419_v38 = vor.u32 %v3973_v51, %v3416_v55  ;;  %v3279_v58 = vor.u32 %v3939_v9, %v3278_v56  ;;  %v3967_v14 = vld [vmem:[#allocation6 + $0x1fc] sm:$0xf] }
 0x18a   :  { %v1028_v59 = vmul.f32 %v4376_v49, %v4376_v49  ;;  %v1010_v50 = vrot.slane %v4378_v21, 4  ;;  %1638 = vmatpush.bf16.msra.mxu0 %v3251_v32  ;;  %1609 = vmatpush.bf16.msrb.mxu2 %v3379_v40  ;;  %v3239_v54 = vor.u32 %v3928_v48, %v3236_v27  ;;  %v3395_v22 = vor.u32 %v3967_v14, %v3392_v16  ;;  %v3242_v32 = vld [vmem:[#allocation6 + $0xc8] sm:$0xf]  ;;  %v3230_v40 = vld [vmem:[#allocation6 + $0xb0] sm:$0xf] }
 0x18b   :  { %1673 = vmatpush.bf16.msra.mxu3 %v3303_v17  ;;  %v3254_v17 = vld [vmem:[#allocation6 + $0xe0] sm:$0xf]  ;;  %v3927_v48 = vld [vmem:[#allocation6 + $0xb8] sm:$0xf0]  ;;  %v3194_v14 = vld [vmem:[#allocation6 + $0x68] sm:$0xf] }
 0x18c   :  { %v1031_v1 = vrot.slane %v1028_v59, 4  ;;  %v1011_v2 = vadd.f32 %v1010_v50, %v4378_v21  ;;  %v3231_v51 = vor.u32 %v3927_v48, %v3230_v40  ;;  %v3918_v16 = vld [vmem:[#allocation6 + $0x70] sm:$0xf0] }
 0x18d   :  { %v950_v5 = vpop.f32.mrf.mxu3  ;;  %v989_v6 = vpop.f32.mrf.mxu2  ;;  %1598 = vmatpush.bf16.msrb.mxu1 %v3259_v7  ;;  %v3936_v7 = vld [vmem:[#allocation6 + $0x100] sm:$0xf0] }
 0x18e   :  { %v1032_v10 = vadd.f32 %v1031_v1, %v1028_v59  ;;  %v1012_v11 = vrot.slane %v1011_v2, 2  ;;  %v3366_v59 = vld [vmem:[#allocation6 + $0x1c8] sm:$0xf]  ;;  %1639 = vmatpush.bf16.msra.mxu0 %v3239_v54  ;;  %v3404_v1 = vld [vmem:[#allocation6 + $0x21c] sm:$0xf0] }
 0x18f   :  { %v976_v12 = vpop.f32.mrf.mxu1  ;;  %1674 = vmatpush.bf16.msra.mxu3 %v3291_v35  ;;  %v3367_v60 = vor.u32 %v3962_v63, %v3366_v59  ;;  %v3407_v6 = vor.u32 %v3970_v0, %v3404_v1  ;;  %v3356_v0 = vld [vmem:[#allocation6 + $0x1bc] sm:$0xf0] }
 0x190   :  { %v1033_v19 = vrot.slane %v1032_v10, 2  ;;  %v1013_v20 = vadd.f32 %v1012_v11, %v1011_v2  ;;  %v3266_v2 = vld [vmem:[#allocation6 + $0xf8] sm:$0xf] }
 0x191   :  { %1599 = vmatpush.bf16.msrb.mxu1 %v3247_v25  ;;  %1610 = vmatpush.bf16.msrb.mxu2 %v3367_v60  ;;  %v3956_v25 = vld [vmem:[#allocation6 + $0x1a0] sm:$0xf0]  ;;  %v3958_v60 = vld [vmem:[#allocation6 + $0x1b4] sm:$0xf] }
 0x192   :  { %v1034_v30 = vadd.f32 %v1033_v19, %v1032_v10  ;;  %v1014_v31 = vrot.slane %v1013_v20, 1  ;;  %v3343_v29 = vor.u32 %v3956_v25, %v3342_v24 }
 0x193   :  { %1675 = vmatpush.bf16.msra.mxu3 %v3279_v58  ;;  %v3924_v58 = vld [vmem:[#allocation6 + $0xa0] sm:$0xf0] }
 0x194   :  { %v1035_v37 = vrot.slane %v1034_v30, 1  ;;  %v1015_v15 = vadd.f32 %v1014_v31, %v1013_v20  ;;  %v3933_v20 = vld [vmem:[#allocation6 + $0xe8] sm:$0xf0]  ;;  %v3380_v31 = vld [vmem:[#allocation6 + $0x1ec] sm:$0xf0] }
 0x195   :  { %v1000_v45 = vpop.f32.mrf.mxu3  ;;  %1600 = vmatpush.bf16.msrb.mxu1 %v3235_v47  ;;  %1611 = vmatpush.bf16.msrb.mxu2 %v3355_v13  ;;  %v3255_v23 = vor.u32 %v3933_v20, %v3254_v17  ;;  %v3975_v20 = vld [vmem:[#allocation6 + $0x238] sm:$0xf0] }
 0x196   :  { %v1036_v46 = vadd.f32 %v1035_v37, %v1034_v30  ;;  %v1023_v52 = vmul.f32 %v1015_v15, %v4327_v57  ;;  %v4387_v53 = vadd.f32 %v1000_v45, %v988_v39  ;;  %v3964_v30 = vld [vmem:[#allocation6 + $0x1e4] sm:$0xf]  ;;  %v3243_v37 = vor.u32 %v3930_v36, %v3242_v32  ;;  %v3330_v15 = vld [vmem:[#allocation6 + $0x180] sm:$0xf]  ;;  %v3953_v39 = vld [vmem:[#allocation6 + $0x188] sm:$0xf0] }
 0x197   :  { %v3383_v35 = vor.u32 %v3964_v30, %v3380_v31  ;;  %v3331_v47 = vor.u32 %v3953_v39, %v3330_v15  ;;  %v3915_v30 = vld [vmem:[#allocation6 + $0x58] sm:$0xf0]  ;;  %v3170_v15 = vld [vmem:[#allocation6 + $0x38] sm:$0xf]  ;;  %v3912_v39 = vld [vmem:[#allocation6 + $0x40] sm:$0xf0] }
 0x198   :  { %v1049_v50 = vmul.f32 %v1036_v46, %v4327_v57  ;;  %v4391_v61 = vsub.f32 %v4378_v21, %v1023_v52  ;;  %v1016_v62 = vrot.slane %v4387_v53, 4  ;;  %v3267_v21 = vor.u32 %v3936_v7, %v3266_v2  ;;  %v3961_v46 = vld [vmem:[#allocation6 + $0x1cc] sm:$0xf]  ;;  %v3368_v52 = vld [vmem:[#allocation6 + $0x1d4] sm:$0xf0] }
 0x199   :  { %1645 = vmatpush.bf16.msra.mxu1 %v3419_v38  ;;  %1612 = vmatpush.bf16.msrb.mxu2 %v3343_v29  ;;  %v3371_v56 = vor.u32 %v3961_v46, %v3368_v52  ;;  %v3218_v38 = vld [vmem:[#allocation6 + $0x98] sm:$0xf]  ;;  %v3182_v29 = vld [vmem:[#allocation6 + $0x50] sm:$0xf]  ;;  %v3171_v48 = vor.u32 %v3912_v39, %v3170_v15  ;;  %v3909_v46 = vld [vmem:[#allocation6 + $0x28] sm:$0xf0] }
 0x19a   :  { %v1052_v3 = vmax.f32 %v1049_v50, 0.0  ;;  %v1029_v4 = vmul.f32 %v4391_v61, %v4391_v61  ;;  %v1017_v5 = vadd.f32 %v1016_v62, %v4387_v53  ;;  %1676 = vmatpush.bf16.msra.mxu3 %v3267_v21  ;;  %v3219_v62 = vor.u32 %v3924_v58, %v3218_v38  ;;  %v3966_v38 = vld [vmem:[#allocation6 + $0x1f0] sm:$0xf0]  ;;  %v3989_v39 = vld [vmem:[#allocation7 + $0x68] sm:$0xf0] }
 0x19c   :  { %v4397_v8 = vadd.f32 1e-05, %v1052_v3  ;;  %v1037_v10 = vrot.slane %v1029_v4, 4  ;;  %v1018_v11 = vrot.slane %v1017_v5, 2 }
 0x19d   :  { %v1002_v12 = vpop.f32.mrf.mxu3  ;;  %1646 = vmatpush.bf16.msra.mxu1 %v3407_v6  ;;  %1613 = vmatpush.bf16.msrb.mxu2 %v3331_v47  ;;  %v3969_v47 = vld [vmem:[#allocation6 + $0x208] sm:$0xf0] }
 0x19e   :  { %4091 = vrsqrt.f32 %v4397_v8  ;;  %v1038_v18 = vadd.f32 %v1037_v10, %v1029_v4  ;;  %v1019_v19 = vadd.f32 %v1018_v11, %v1017_v5  ;;  %1677 = vmatpush.bf16.msra.mxu3 %v3255_v23  ;;  %v3206_v4 = vld [vmem:[#allocation6 + $0x80] sm:$0xf]  ;;  %v3921_v5 = vld [vmem:[#allocation6 + $0x88] sm:$0xf0]  ;;  %vm1064_vm11 = vweird.f32 %v4397_v8  ;;  %v3344_v10 = vld [vmem:[#allocation6 + $0x1a4] sm:$0xf0] }
 0x19f   :  { %v3207_v21 = vor.u32 %v3921_v5, %v3206_v4  ;;  %v3347_v12 = vor.u32 %v3955_v41, %v3344_v10  ;;  %v3332_v23 = vld [vmem:[#allocation6 + $0x18c] sm:$0xf0] }
 0x1a0   :  { %v1039_v26 = vrot.slane %v1038_v18, 2  ;;  %v1020_v28 = vrot.slane %v1019_v19, 1 }
 0x1a1   :  { %1647 = vmatpush.bf16.msra.mxu1 %v3395_v22  ;;  %1658 = vmatpush.bf16.msra.mxu2 %v3231_v51  ;;  %v3195_v22 = vor.u32 %v3918_v16, %v3194_v14  ;;  %v3158_v51 = vld [vmem:[#allocation6 + $0x20] sm:$0xf] }
 0x1a2   :  { %v1040_v33 = vadd.f32 %v1039_v26, %v1038_v18  ;;  %v1021_v34 = vadd.f32 %v1020_v28, %v1019_v19  ;;  %1678 = vmatpush.bf16.msra.mxu3 %v3243_v37  ;;  %v3422_v19 = vld [vmem:[#allocation6 + $0x230] sm:$0xf]  ;;  %v3159_v58 = vor.u32 %v3909_v46, %v3158_v51 }
 0x1a3   :  { %v3423_v28 = vor.u32 %v3975_v20, %v3422_v19 }
 0x1a4   :  { %v4092_v43 = vpop.eup %4091  ;;  %v1041_v44 = vrot.slane %v1040_v33, 1  ;;  %v1024_v45 = vmul.f32 %v1021_v34, %v4327_v57  ;;  %v3972_v34 = vld [vmem:[#allocation6 + $0x220] sm:$0xf0] }
 0x1a5   :  { %v1059_v27 = vmul.f32 %v4092_v43, %v4397_v8  ;;  %1648 = vmatpush.bf16.msra.mxu1 %v3383_v35  ;;  %vm1065_vm10 = vweird.f32 %v4092_v43  ;;  %1659 = vmatpush.bf16.msra.mxu2 %v3219_v62  ;;  %v3952_v8 = vld [vmem:[#allocation6 + $0x184] sm:$0xf]  ;;  %v3183_v35 = vor.u32 %v3915_v30, %v3182_v29  ;;  %v3906_v62 = vld [vmem:[#allocation6 + $0x10] sm:$0xf0]  ;;  %v3498_v30 = vld [vmem:[#allocation7 + $0x90] sm:$0xf] }
 0x1a6   :  { %v1042_v54 = vadd.f32 %v1041_v44, %v1040_v33  ;;  %v4403_v55 = vsub.f32 %v4387_v53, %v1024_v45  ;;  %v3359_v53 = vor.u32 %v3958_v60, %v3356_v0  ;;  %vm1066_vm12 = vmor %vm1064_vm11, %vm1065_vm10  ;;  %v3335_v26 = vor.u32 %v3952_v8, %v3332_v23  ;;  %v3410_v33 = vld [vmem:[#allocation6 + $0x218] sm:$0xf]  ;;  %v3398_v45 = vld [vmem:[#allocation6 + $0x200] sm:$0xf] }
 0x1a7   :  { %v1060_v9 = vmul.f32 %v4092_v43, %v1059_v27 }
 0x1a8   :  { %v1050_v59 = vmul.f32 %v1042_v54, %v4327_v57  ;;  %v1030_v50 = vmul.f32 %v4403_v55, %v4403_v55 }
 0x1a9   :  { %v1061_v63 = vmul.f32 0.5, %v1060_v9  ;;  %1649 = vmatpush.bf16.msra.mxu1 %v3371_v56  ;;  %1660 = vmatpush.bf16.msra.mxu2 %v3207_v21  ;;  %v3399_v56 = vor.u32 %v3969_v47, %v3398_v45  ;;  %v3386_v9 = vld [vmem:[#allocation6 + $0x1e8] sm:$0xf]  ;;  %v3362_v21 = vld [vmem:[#allocation6 + $0x1b8] sm:$0xf] }
 0x1aa   :  { %v1053_v1 = vmax.f32 %v1050_v59, 0.0  ;;  %v1043_v2 = vrot.slane %v1030_v50, 4  ;;  %v3387_v60 = vor.u32 %v3966_v38, %v3386_v9  ;;  %v3994_v38 = vld [vmem:[#allocation7 + $0x94] sm:$0xf] }
 0x1ab   :  { %v1062_v3 = vsub.f32 1.5, %v1061_v63 }
 0x1ac   :  { %v4408_v6 = vadd.f32 1e-05, %v1053_v1  ;;  %v1044_v7 = vadd.f32 %v1043_v2, %v1030_v50  ;;  %v3146_v50 = vld [vmem:[#allocation6 + $0x8] sm:$0xf]  ;;  %v3374_v1 = vld [vmem:[#allocation6 + $0x1d0] sm:$0xf] }
 0x1ad   :  { %v1063_v42 = vmul.f32 %v4092_v43, %v1062_v3  ;;  %1650 = vmatpush.bf16.msra.mxu1 %v3359_v53  ;;  %1661 = vmatpush.bf16.msra.mxu2 %v3195_v22  ;;  %v3963_v2 = vld [vmem:[#allocation6 + $0x1d8] sm:$0xf0]  ;;  %v3147_v53 = vor.u32 %v3906_v62, %v3146_v50  ;;  %v3594_v50 = vld [vmem:[#allocation7 + $0x150] sm:$0xf] }
 0x1ae   :  { %4093 = vrsqrt.f32 %v4408_v6  ;;  %v1045_v11 = vrot.slane %v1044_v7, 2  ;;  %vm1074_vm14 = vweird.f32 %v4408_v6  ;;  %v4019_v62 = vld [vmem:[#allocation7 + $0x158] sm:$0xf0] }
 0x1af   :  { %v1067_v13 = vsel %vm1066_vm12, %v4092_v43, %v1063_v42  ;;  %v3411_v43 = vor.u32 %v3972_v34, %v3410_v33  ;;  %v3960_v42 = vld [vmem:[#allocation6 + $0x1c0] sm:$0xf0] }
 0x1b0   :  { %v1088_v17 = vmul.f32 %v1067_v13, %v4376_v49  ;;  %v1046_v18 = vadd.f32 %v1045_v11, %v1044_v7  ;;  %v3375_v7 = vor.u32 %v3963_v2, %v3374_v1  ;;  %v3363_v10 = vor.u32 %v3960_v42, %v3362_v21  ;;  %v3350_v11 = vld [vmem:[#allocation6 + $0x1a0] sm:$0xf]  ;;  %v3991_v2 = vld [vmem:[#allocation7 + $0x7c] sm:$0xf] }
 0x1b1   :  { %1651 = vmatpush.bf16.msra.mxu1 %v3347_v12  ;;  %1662 = vmatpush.bf16.msra.mxu2 %v3183_v35  ;;  %v3957_v12 = vld [vmem:[#allocation6 + $0x1a8] sm:$0xf0] }
 0x1b2   :  { %v1091_v24 = vmax.f32 %v1088_v17, 0.0  ;;  %v1047_v25 = vrot.slane %v1046_v18, 1  ;;  %v3351_v16 = vor.u32 %v3957_v12, %v3350_v11  ;;  %v3338_v17 = vld [vmem:[#allocation6 + $0x188] sm:$0xf] }
 0x1b4   :  { %v4094_v31 = vpop.eup %4093  ;;  %1094 = vst [vmem:[%s4542_s7 + $0x18] sm:$0xff] %v1091_v24  ;;  %v1048_v49 = vadd.f32 %v1047_v25, %v1046_v18  ;;  %v4416_v32 = vpack.c.bf16 %v1091_v24, %v1091_v24  ;;  %v3954_v18 = vld [vmem:[#allocation6 + $0x190] sm:$0xf0] }
 0x1b5   :  { %v1069_v36 = vmul.f32 %v4094_v31, %v4408_v6  ;;  %1652 = vmatpush.bf16.msra.mxu1 %v3335_v26  ;;  %vm1075_vm13 = vweird.f32 %v4094_v31  ;;  %1663 = vmatpush.bf16.msra.mxu2 %v3171_v48  ;;  %v3339_v22 = vor.u32 %v3954_v18, %v3338_v17  ;;  %v3606_v48 = vld [vmem:[#allocation7 + $0x168] sm:$0xf] }
 0x1b6   :  { %v1051_v37 = vmul.f32 %v1048_v49, %v4327_v57  ;;  %1588 = vmatmul.bf16.vlgmr.msrb.gmra.mxu0 %v4416_v32  ;;  %1627 = vmatmul.bf16.vlgmr.msrb.gmra.mxu3 %v4416_v32  ;;  %vm1076_vm15 = vmor %vm1074_vm14, %vm1075_vm13 }
 0x1b7   :  { %v1070_v40 = vmul.f32 %v4094_v31, %v1069_v36  ;;  %1684 = vmatpush.bf16.msrb.mxu0 %v3423_v28  ;;  %v3510_v28 = vld [vmem:[#allocation7 + $0xa8] sm:$0xf]  ;;  %v3486_v36 = vld [vmem:[#allocation7 + $0x78] sm:$0xf] }
 0x1b8   :  { %v1054_v44 = vmax.f32 %v1051_v37, 0.0  ;;  %v3992_v37 = vld [vmem:[#allocation7 + $0x80] sm:$0xf0] }
 0x1b9   :  { %v1071_v27 = vmul.f32 0.5, %v1070_v40  ;;  %1664 = vmatpush.bf16.msra.mxu2 %v3159_v58  ;;  %v3487_v15 = vor.u32 %v3992_v37, %v3486_v36  ;;  %v3500_v58 = vld [vmem:[#allocation7 + $0x9c] sm:$0xf0]  ;;  %v3558_v36 = vld [vmem:[#allocation7 + $0x108] sm:$0xf] }
 0x1ba   :  { %v1057_v52 = vadd.f32 1e-05, %v1054_v44  ;;  %v3512_v44 = vld [vmem:[#allocation7 + $0xb4] sm:$0xf0]  ;;  %v4010_v37 = vld [vmem:[#allocation7 + $0x110] sm:$0xf0] }
 0x1bb   :  { %v1072_v54 = vsub.f32 1.5, %v1071_v27  ;;  %1685 = vmatpush.bf16.msrb.mxu0 %v3411_v43  ;;  %v3997_v43 = vld [vmem:[#allocation7 + $0xac] sm:$0xf]  ;;  %v4022_v27 = vld [vmem:[#allocation7 + $0x170] sm:$0xf0] }
 0x1bc   :  { %4095 = vrsqrt.f32 %v1057_v52  ;;  %vm1084_vm1 = vweird.f32 %v1057_v52  ;;  %v3515_v45 = vor.u32 %v3997_v43, %v3512_v44  ;;  %v4046_v43 = vld [vmem:[#allocation7 + $0x230] sm:$0xf0] }
 0x1bd   :  { %v1073_v59 = vmul.f32 %v4094_v31, %v1072_v54  ;;  %1665 = vmatpush.bf16.msra.mxu2 %v3147_v53  ;;  %v3462_v54 = vld [vmem:[#allocation7 + $0x48] sm:$0xf] }
 0x1be   :  { %v3488_v53 = vld [vmem:[#allocation7 + $0x84] sm:$0xf0] }
 0x1bf   :  { %v1077_v63 = vsel %vm1076_vm15, %v4094_v31, %v1073_v59  ;;  %1686 = vmatpush.bf16.msrb.mxu0 %v3399_v56  ;;  %v3995_v31 = vld [vmem:[#allocation7 + $0x98] sm:$0xf0]  ;;  %v3986_v56 = vld [vmem:[#allocation7 + $0x50] sm:$0xf0]  ;;  %v3503_v59 = vor.u32 %v3994_v38, %v3500_v58  ;;  %v3546_v58 = vld [vmem:[#allocation7 + $0xf0] sm:$0xf] }
 0x1c0   :  { %v1089_v0 = vmul.f32 %v1077_v63, %v4391_v61  ;;  %v3499_v49 = vor.u32 %v3995_v31, %v3498_v30  ;;  %v3463_v9 = vor.u32 %v3986_v56, %v3462_v54  ;;  %v3595_v63 = vor.u32 %v4019_v62, %v3594_v50  ;;  %v3464_v30 = vld [vmem:[#allocation7 + $0x54] sm:$0xf0]  ;;  %v4021_v31 = vld [vmem:[#allocation7 + $0x16c] sm:$0xf]  ;;  %v3596_v54 = vld [vmem:[#allocation7 + $0x15c] sm:$0xf0] }
 0x1c2   :  { %v4096_v3 = vpop.eup %4095  ;;  %v1092_v4 = vmax.f32 %v1089_v0, 0.0  ;;  %v3983_v0 = vld [vmem:[#allocation7 + $0x38] sm:$0xf0] }
 0x1c3   :  { %v1079_v5 = vmul.f32 %v4096_v3, %v1057_v52  ;;  %1687 = vmatpush.bf16.msrb.mxu0 %v3387_v60  ;;  %vm1085_vm0 = vweird.f32 %v4096_v3  ;;  %v3607_v52 = vor.u32 %v4022_v27, %v3606_v48  ;;  %v3450_v60 = vld [vmem:[#allocation7 + $0x30] sm:$0xf]  ;;  %v3982_v27 = vld [vmem:[#allocation7 + $0x34] sm:$0xf] }
 0x1c4   :  { %1095 = vst [vmem:[%s4542_s7 + $0x20] sm:$0xff] %v1092_v4  ;;  %v1098_v6 = vpack.c.bf16 %v1092_v4, %v1092_v4  ;;  %vm1086_vm2 = vmor %vm1084_vm1, %vm1085_vm0  ;;  %v3451_v1 = vor.u32 %v3983_v0, %v3450_v60  ;;  %v4043_v60 = vld [vmem:[#allocation7 + $0x218] sm:$0xf0] }
 0x1c5   :  { %v1080_v41 = vmul.f32 %v4096_v3, %v1079_v5 }
 0x1c6   :  { %1601 = vmatmul.bf16.vlgmr.msrb.gmra.mxu1 %v1098_v6  ;;  %1640 = vmatmul.bf16.vlgmr.msra.gmra.mxu0 %v1098_v6 }
 0x1c7   :  { %v1081_v61 = vmul.f32 0.5, %v1080_v41  ;;  %1679 = vmatmul.bf16.vlgmr.msra.gmra.mxu3 %v1098_v6  ;;  %1688 = vmatpush.bf16.msrb.mxu0 %v3375_v7  ;;  %v3582_v7 = vld [vmem:[#allocation7 + $0x138] sm:$0xf]  ;;  %v4016_v6 = vld [vmem:[#allocation7 + $0x140] sm:$0xf0] }
 0x1c8   :  { %v3583_v41 = vor.u32 %v4016_v6, %v3582_v7  ;;  %v3584_v7 = vld [vmem:[#allocation7 + $0x144] sm:$0xf0] }
 0x1c9   :  { %v1082_v13 = vsub.f32 1.5, %v1081_v61  ;;  %v3438_v61 = vld [vmem:[#allocation7 + $0x18] sm:$0xf] }
 0x1cb   :  { %v1083_v14 = vmul.f32 %v4096_v3, %v1082_v13  ;;  %1689 = vmatpush.bf16.msrb.mxu0 %v3363_v10  ;;  %v3980_v10 = vld [vmem:[#allocation7 + $0x20] sm:$0xf0] }
 0x1cc   :  { %v3439_v12 = vor.u32 %v3980_v10, %v3438_v61  ;;  %v3988_v13 = vld [vmem:[#allocation7 + $0x64] sm:$0xf]  ;;  %v3534_v61 = vld [vmem:[#allocation7 + $0xd8] sm:$0xf] }
 0x1cd   :  { %v1087_v19 = vsel %vm1086_vm2, %v4096_v3, %v1083_v14  ;;  %v3491_v3 = vor.u32 %v3991_v2, %v3488_v53  ;;  %v3476_v14 = vld [vmem:[#allocation7 + $0x6c] sm:$0xf0]  ;;  %v3979_v53 = vld [vmem:[#allocation7 + $0x1c] sm:$0xf]  ;;  %v4004_v10 = vld [vmem:[#allocation7 + $0xe0] sm:$0xf0] }
 0x1ce   :  { %v1090_v20 = vmul.f32 %v1087_v19, %v4403_v55  ;;  %v3998_v55 = vld [vmem:[#allocation7 + $0xb0] sm:$0xf0]  ;;  %v3570_v19 = vld [vmem:[#allocation7 + $0x120] sm:$0xf] }
 0x1cf   :  { %1690 = vmatpush.bf16.msrb.mxu0 %v3351_v16  ;;  %v3511_v29 = vor.u32 %v3998_v55, %v3510_v28  ;;  %v3479_v16 = vor.u32 %v3988_v13, %v3476_v14  ;;  %v3678_v13 = vld [vmem:[#allocation7 + $0x1f8] sm:$0xf]  ;;  %v4040_v14 = vld [vmem:[#allocation7 + $0x200] sm:$0xf0] }
 0x1d0   :  { %v1093_v8 = vmax.f32 %v1090_v20, 0.0  ;;  %v4013_v20 = vld [vmem:[#allocation7 + $0x128] sm:$0xf0] }
 0x1d1   :  { %2273 = vmatpush.bf16.msrb.mxu1 %v3511_v29  ;;  %v3985_v29 = vld [vmem:[#allocation7 + $0x4c] sm:$0xf] }
 0x1d2   :  { %1096 = vst [vmem:[%s4542_s7 + $0x28] sm:$0xff] %v1093_v8  ;;  %v1099_v23 = vpack.c.bf16 %v1093_v8, %v1093_v8  ;;  %v3571_v8 = vor.u32 %v4013_v20, %v3570_v19  ;;  %v3976_v19 = vld [vmem:[#allocation7 + $0x4] sm:$0xf]  ;;  %v3428_v20 = vld [vmem:[#allocation7 + $0xc] sm:$0xf0] }
 0x1d3   :  { %1691 = vmatpush.bf16.msrb.mxu0 %v3339_v22 }
 0x1d4   :  { %1614 = vmatmul.bf16.vlgmr.msrb.gmra.mxu2 %v1099_v23 }
 0x1d5   :  { %2274 = vmatpush.bf16.msrb.mxu1 %v3499_v49  ;;  %2286 = vmatpush.bf16.msrb.mxu2 %v3607_v52  ;;  %v3608_v49 = vld [vmem:[#allocation7 + $0x174] sm:$0xf0] }
 0x1d6   :  { %1653 = vmatmul.bf16.vlgmr.msra.gmra.mxu1 %v1099_v23  ;;  %1692 = vmatmul.bf16.vlgmr.msrb.gmra.mxu0 %v1099_v23  ;;  %v3426_v23 = vld [vmem:[#allocation7] sm:$0xf] }
 0x1d7   :  { %2312 = vmatpush.bf16.msra.mxu0 %v3515_v45 }
 0x1d9   :  { %2275 = vmatpush.bf16.msrb.mxu1 %v3487_v15  ;;  %2287 = vmatpush.bf16.msrb.mxu2 %v3595_v63  ;;  %v3690_v63 = vld [vmem:[#allocation7 + $0x210] sm:$0xf] }
 0x1da   :  { %v3691_v2 = vor.u32 %v4043_v60, %v3690_v63  ;;  %v4006_v60 = vld [vmem:[#allocation7 + $0xf4] sm:$0xf] }
 0x1db   :  { %2313 = vmatpush.bf16.msra.mxu0 %v3503_v59  ;;  %v4007_v59 = vld [vmem:[#allocation7 + $0xf8] sm:$0xf0] }
 0x1dc   :  { %v3547_v62 = vor.u32 %v4007_v59, %v3546_v58  ;;  %v3692_v58 = vld [vmem:[#allocation7 + $0x21c] sm:$0xf0] }
 0x1dd   :  { %2288 = vmatpush.bf16.msrb.mxu2 %v3583_v41 }
 0x1df   :  { %2314 = vmatpush.bf16.msra.mxu0 %v3491_v3  ;;  %v3440_v3 = vld [vmem:[#allocation7 + $0x24] sm:$0xf0] }
 0x1e1   :  { %2289 = vmatpush.bf16.msrb.mxu2 %v3571_v8  ;;  %v3431_v8 = vor.u32 %v3976_v19, %v3428_v20  ;;  %v3536_v19 = vld [vmem:[#allocation7 + $0xe4] sm:$0xf0] }
 0x1e2   :  { %v3578_v20 = vld [vmem:[#allocation7 + $0x128] sm:$0xf] }
 0x1e3   :  { %2315 = vmatpush.bf16.msra.mxu0 %v3479_v16 }
 0x1e4   :  { %1666 = vmatmul.bf16.vlgmr.msra.gmra.mxu2 %v4416_v32  ;;  %v3474_v32 = vld [vmem:[#allocation7 + $0x60] sm:$0xf] }
 0x1e5   :  { %v3475_v40 = vor.u32 %v3989_v39, %v3474_v32  ;;  %v3559_v39 = vor.u32 %v4010_v37, %v3558_v36  ;;  %v4045_v36 = vld [vmem:[#allocation7 + $0x22c] sm:$0xf]  ;;  %v3704_v37 = vld [vmem:[#allocation7 + $0x234] sm:$0xf0] }
 0x1e7   :  { %2276 = vmatpush.bf16.msrb.mxu1 %v3475_v40  ;;  %v3702_v40 = vld [vmem:[#allocation7 + $0x228] sm:$0xf]  ;;  %2290 = vmatpush.bf16.msrb.mxu2 %v3559_v39 }
 0x1e8   :  { %v3703_v48 = vor.u32 %v4046_v43, %v3702_v40  ;;  %v4009_v43 = vld [vmem:[#allocation7 + $0x10c] sm:$0xf] }
 0x1ea   :  { %2299 = vmatpush.bf16.msrb.mxu3 %v3703_v48 }
 0x1eb   :  { %2277 = vmatpush.bf16.msrb.mxu1 %v3463_v9  ;;  %2291 = vmatpush.bf16.msrb.mxu2 %v3547_v62 }
 0x1ee   :  { %2300 = vmatpush.bf16.msrb.mxu3 %v3691_v2 }
 0x1ef   :  { %2278 = vmatpush.bf16.msrb.mxu1 %v3451_v1 }
 0x1f3   :  { %2279 = vmatpush.bf16.msrb.mxu1 %v3439_v12  ;;  %v3535_v12 = vor.u32 %v4004_v10, %v3534_v61  ;;  %v4039_v61 = vld [vmem:[#allocation7 + $0x1fc] sm:$0xf]  ;;  %v3680_v10 = vld [vmem:[#allocation7 + $0x204] sm:$0xf0] }
 0x1f5   :  { %2292 = vmatpush.bf16.msrb.mxu2 %v3535_v12 }
 0x233   :  { %v4432_v24 = vpop.f32.mrf.mxu0 }
 0x239   :  { %v1628_v25 = vpop.f32.mrf.mxu3 }
 0x23b   :  { %v1591_v26 = vpop.f32.mrf.mxu0 }
 0x241   :  { %v1630_v33 = vpop.f32.mrf.mxu3 }
 0x243   :  { %v1602_v34 = vpop.f32.mrf.mxu1  ;;  %v1641_v35 = vpop.f32.mrf.mxu0 }
 0x244   :  { %v1642_v4 = vadd.f32 %v1641_v35, %v1628_v25  ;;  %v1603_v17 = vadd.f32 %v1602_v34, %v4432_v24  ;;  %v3977_v25 = vld [vmem:[#allocation7 + $0x8] sm:$0xf0]  ;;  %v3467_v24 = vor.u32 %v3985_v29, %v3464_v30  ;;  %v3611_v35 = vor.u32 %v4021_v31, %v3608_v49  ;;  %v3522_v31 = vld [vmem:[#allocation7 + $0xc0] sm:$0xf] }
 0x245   :  { %v3427_v55 = vor.u32 %v3977_v25, %v3426_v23  ;;  %v3572_v23 = vld [vmem:[#allocation7 + $0x12c] sm:$0xf0]  ;;  %v3666_v49 = vld [vmem:[#allocation7 + $0x1e0] sm:$0xf] }
 0x246   :  { %2316 = vmatpush.bf16.msra.mxu0 %v3467_v24  ;;  %v3614_v25 = vld [vmem:[#allocation7 + $0x170] sm:$0xf]  ;;  %v4001_v24 = vld [vmem:[#allocation7 + $0xc8] sm:$0xf0] }
 0x247   :  { %2280 = vmatpush.bf16.msrb.mxu1 %v3427_v55 }
 0x24a   :  { %v4434_v47 = vpop.f32.mrf.mxu3 }
 0x24b   :  { %v1604_v51 = vpop.f32.mrf.mxu1  ;;  %v1643_v46 = vpop.f32.mrf.mxu0  ;;  %2325 = vmatpush.bf16.msra.mxu1 %v3611_v35  ;;  %v4037_v35 = vld [vmem:[#allocation7 + $0x1e8] sm:$0xf0] }
 0x24c   :  { %v3452_v51 = vld [vmem:[#allocation7 + $0x3c] sm:$0xf0]  ;;  %v4018_v46 = vld [vmem:[#allocation7 + $0x154] sm:$0xf]  ;;  %v3667_v40 = vor.u32 %v4037_v35, %v3666_v49 }
 0x24d   :  { %v3455_v52 = vor.u32 %v3982_v27, %v3452_v51  ;;  %v3599_v38 = vor.u32 %v4018_v46, %v3596_v54  ;;  %v3602_v27 = vld [vmem:[#allocation7 + $0x158] sm:$0xf]  ;;  %v4020_v51 = vld [vmem:[#allocation7 + $0x160] sm:$0xf0] }
 0x24f   :  { %2317 = vmatpush.bf16.msra.mxu0 %v3455_v52  ;;  %2326 = vmatpush.bf16.msra.mxu1 %v3599_v38  ;;  %v4042_v38 = vld [vmem:[#allocation7 + $0x214] sm:$0xf] }
 0x250   :  { %v3695_v63 = vor.u32 %v4042_v38, %v3692_v58  ;;  %v3518_v38 = vld [vmem:[#allocation7 + $0xb0] sm:$0xf]  ;;  %v3999_v58 = vld [vmem:[#allocation7 + $0xb8] sm:$0xf0] }
 0x252   :  { %v1682_v5 = vpop.f32.mrf.mxu3 }
 0x253   :  { %v1654_v21 = vpop.f32.mrf.mxu1  ;;  %v4436_v42 = vpop.f32.mrf.mxu0  ;;  %v3443_v5 = vor.u32 %v3979_v53, %v3440_v3 }
 0x254   :  { %v4438_v11 = vadd.f32 %v1654_v21, %v1642_v4  ;;  %v4015_v4 = vld [vmem:[#allocation7 + $0x13c] sm:$0xf] }
 0x255   :  { %v3587_v41 = vor.u32 %v4015_v4, %v3584_v7  ;;  %2318 = vmatpush.bf16.msra.mxu0 %v3443_v5  ;;  %v3642_v5 = vld [vmem:[#allocation7 + $0x1b0] sm:$0xf]  ;;  %v4031_v7 = vld [vmem:[#allocation7 + $0x1b8] sm:$0xf0] }
 0x256   :  { %v1703_v18 = vrot.slane %v4438_v11, 4 }
 0x257   :  { %v1615_v22 = vpop.f32.mrf.mxu2  ;;  %2327 = vmatpush.bf16.msra.mxu1 %v3587_v41  ;;  %v3643_v41 = vor.u32 %v4031_v7, %v3642_v5  ;;  %v3996_v7 = vld [vmem:[#allocation7 + $0xa0] sm:$0xf0] }
 0x258   :  { %v1704_v26 = vadd.f32 %v1703_v18, %v4438_v11  ;;  %v4443_v28 = vadd.f32 %v1615_v22, %v1603_v17  ;;  %v3679_v18 = vor.u32 %v4040_v14, %v3678_v13  ;;  %v4012_v22 = vld [vmem:[#allocation7 + $0x124] sm:$0xf] }
 0x259   :  { %v3575_v30 = vor.u32 %v4012_v22, %v3572_v23  ;;  %2319 = vmatpush.bf16.msra.mxu0 %v3431_v8  ;;  %v4014_v22 = vld [vmem:[#allocation7 + $0x130] sm:$0xf0] }
 0x25a   :  { %v1705_v33 = vrot.slane %v1704_v26, 2  ;;  %v1697_v34 = vrot.slane %v4443_v28, 4  ;;  %2301 = vmatpush.bf16.msrb.mxu3 %v3679_v18  ;;  %v4003_v18 = vld [vmem:[#allocation7 + $0xdc] sm:$0xf] }
 0x25b   :  { %v1656_v15 = vpop.f32.mrf.mxu1  ;;  %v1695_v32 = vpop.f32.mrf.mxu0  ;;  %2328 = vmatpush.bf16.msra.mxu1 %v3575_v30  ;;  %v3579_v30 = vor.u32 %v4014_v22, %v3578_v20 }
 0x25c   :  { %v1706_v44 = vadd.f32 %v1705_v33, %v1704_v26  ;;  %v1698_v45 = vadd.f32 %v1697_v34, %v4443_v28  ;;  %v4023_v26 = vld [vmem:[#allocation7 + $0x178] sm:$0xf0]  ;;  %v3523_v34 = vor.u32 %v4001_v24, %v3522_v31  ;;  %v4036_v31 = vld [vmem:[#allocation7 + $0x1e4] sm:$0xf]  ;;  %v3668_v24 = vld [vmem:[#allocation7 + $0x1ec] sm:$0xf0] }
 0x25d   :  { %v3671_v35 = vor.u32 %v4036_v31, %v3668_v24 }
 0x25e   :  { %v1707_v56 = vrot.slane %v1706_v44, 1  ;;  %v1699_v9 = vrot.slane %v1698_v45, 2  ;;  %2293 = vmatpush.bf16.msrb.mxu2 %v3523_v34  ;;  %2302 = vmatpush.bf16.msrb.mxu3 %v3667_v40  ;;  %v4011_v40 = vld [vmem:[#allocation7 + $0x118] sm:$0xf0] }
 0x25f   :  { %v1617_v50 = vpop.f32.mrf.mxu2 }
 0x260   :  { %v1708_v0 = vadd.f32 %v1707_v56, %v1706_v44  ;;  %v1700_v1 = vadd.f32 %v1699_v9, %v1698_v45  ;;  %v3560_v44 = vld [vmem:[#allocation7 + $0x114] sm:$0xf0]  ;;  %v3707_v45 = vor.u32 %v4045_v36, %v3704_v37  ;;  %v4034_v56 = vld [vmem:[#allocation7 + $0x1d0] sm:$0xf0]  ;;  %v4000_v36 = vld [vmem:[#allocation7 + $0xc4] sm:$0xf] }
 0x261   :  { %v3563_v48 = vor.u32 %v4009_v43, %v3560_v44  ;;  %v3524_v37 = vld [vmem:[#allocation7 + $0xcc] sm:$0xf0] }
 0x262   :  { %v1716_v6 = vmul.f32 %v1708_v0, %v4327_v57  ;;  %v1701_v21 = vrot.slane %v1700_v1, 1  ;;  %2338 = vmatpush.bf16.msra.mxu2 %v3707_v45  ;;  %v3548_v0 = vld [vmem:[#allocation7 + $0xfc] sm:$0xf0] }
 0x263   :  { %2329 = vmatpush.bf16.msra.mxu1 %v3563_v48  ;;  %v3551_v4 = vor.u32 %v4006_v60, %v3548_v0 }
 0x264   :  { %v4449_v16 = vsub.f32 %v4438_v11, %v1716_v6  ;;  %v1702_v17 = vadd.f32 %v1701_v21, %v1700_v1  ;;  %v3615_v11 = vor.u32 %v4023_v26, %v3614_v25  ;;  %v3590_v1 = vld [vmem:[#allocation7 + $0x140] sm:$0xf]  ;;  %v3539_v26 = vor.u32 %v4003_v18, %v3536_v19  ;;  %v3993_v19 = vld [vmem:[#allocation7 + $0x88] sm:$0xf0] }
 0x266   :  { %v1722_v55 = vmul.f32 %v4449_v16, %v4449_v16  ;;  %v1715_v29 = vmul.f32 %v1702_v17, %v4327_v57  ;;  %2364 = vmatpush.bf16.msrb.mxu0 %v3615_v11  ;;  %2339 = vmatpush.bf16.msra.mxu2 %v3695_v63  ;;  %v3683_v17 = vor.u32 %v4039_v61, %v3680_v10  ;;  %v4008_v63 = vld [vmem:[#allocation7 + $0x100] sm:$0xf0]  ;;  %v4027_v10 = vld [vmem:[#allocation7 + $0x19c] sm:$0xf] }
 0x267   :  { %v1667_v33 = vpop.f32.mrf.mxu2  ;;  %2330 = vmatpush.bf16.msra.mxu1 %v3551_v4 }
 0x268   :  { %v1730_v15 = vrot.slane %v1722_v55, 4  ;;  %v4455_v32 = vsub.f32 %v4443_v28, %v1715_v29  ;;  %v1681_v39 = vadd.f32 %v4434_v47, %v1667_v33  ;;  %v3603_v28 = vor.u32 %v4020_v51, %v3602_v27  ;;  %v3654_v47 = vld [vmem:[#allocation7 + $0x1c8] sm:$0xf]  ;;  %v4028_v29 = vld [vmem:[#allocation7 + $0x1a0] sm:$0xf0] }
 0x269   :  { %v3655_v9 = vor.u32 %v4034_v56, %v3654_v47  ;;  %v3618_v27 = vld [vmem:[#allocation7 + $0x180] sm:$0xf]  ;;  %v4025_v51 = vld [vmem:[#allocation7 + $0x188] sm:$0xf0] }
 0x26a   :  { %v1731_v46 = vadd.f32 %v1730_v15, %v1722_v55  ;;  %v1721_v52 = vmul.f32 %v4455_v32, %v4455_v32  ;;  %v4461_v54 = vadd.f32 %v4436_v42, %v1681_v39  ;;  %2365 = vmatpush.bf16.msrb.mxu0 %v3603_v28  ;;  %v4017_v42 = vld [vmem:[#allocation7 + $0x148] sm:$0xf0]  ;;  %v3630_v55 = vld [vmem:[#allocation7 + $0x198] sm:$0xf]  ;;  %2340 = vmatpush.bf16.msra.mxu2 %v3683_v17  ;;  %v3566_v39 = vld [vmem:[#allocation7 + $0x110] sm:$0xf] }
 0x26b   :  { %2303 = vmatpush.bf16.msrb.mxu3 %v3655_v9  ;;  %v3591_v21 = vor.u32 %v4017_v42, %v3590_v1  ;;  %v3631_v11 = vor.u32 %v4028_v29, %v3630_v55  ;;  %2331 = vmatpush.bf16.msra.mxu1 %v3539_v26  ;;  %v3527_v15 = vor.u32 %v4000_v36, %v3524_v37  ;;  %v4030_v42 = vld [vmem:[#allocation7 + $0x1b4] sm:$0xf]  ;;  %v4024_v29 = vld [vmem:[#allocation7 + $0x184] sm:$0xf] }
 0x26c   :  { %v1732_v59 = vrot.slane %v1731_v46, 2  ;;  %v1724_v50 = vrot.slane %v1721_v52, 4  ;;  %v1709_v62 = vrot.slane %v4461_v54, 4  ;;  %v3567_v48 = vor.u32 %v4011_v40, %v3566_v39  ;;  %v3470_v40 = vld [vmem:[#allocation7 + $0x50] sm:$0xf] }
 0x26d   :  { %v3619_v9 = vor.u32 %v4025_v51, %v3618_v27 }
 0x26e   :  { %v1733_v2 = vadd.f32 %v1732_v59, %v1731_v46  ;;  %v1725_v53 = vadd.f32 %v1724_v50, %v1721_v52  ;;  %v1710_v3 = vadd.f32 %v1709_v62, %v4461_v54  ;;  %2366 = vmatpush.bf16.msrb.mxu0 %v3591_v21  ;;  %2341 = vmatpush.bf16.msra.mxu2 %v3671_v35  ;;  %v4033_v46 = vld [vmem:[#allocation7 + $0x1cc] sm:$0xf]  ;;  %v3656_v52 = vld [vmem:[#allocation7 + $0x1d4] sm:$0xf0]  ;;  %v3542_v21 = vld [vmem:[#allocation7 + $0xe0] sm:$0xf] }
 0x26f   :  { %v1669_v6 = vpop.f32.mrf.mxu2  ;;  %2304 = vmatpush.bf16.msrb.mxu3 %v3643_v41  ;;  %2332 = vmatpush.bf16.msra.mxu1 %v3527_v15  ;;  %v3659_v59 = vor.u32 %v4033_v46, %v3656_v52  ;;  %v3519_v50 = vor.u32 %v3999_v58, %v3518_v38  ;;  %v3554_v62 = vld [vmem:[#allocation7 + $0xf8] sm:$0xf]  ;;  %v4005_v41 = vld [vmem:[#allocation7 + $0xe8] sm:$0xf0] }
 0x270   :  { %v1734_v12 = vrot.slane %v1733_v2, 1  ;;  %v1726_v13 = vrot.slane %v1725_v53, 2  ;;  %v1711_v14 = vrot.slane %v1710_v3, 2  ;;  %v3555_v1 = vor.u32 %v4008_v63, %v3554_v62  ;;  %v3446_v63 = vld [vmem:[#allocation7 + $0x20] sm:$0xf] }
 0x271   :  { %v3543_v61 = vor.u32 %v4005_v41, %v3542_v21  ;;  %v3698_v21 = vld [vmem:[#allocation7 + $0x218] sm:$0xf]  ;;  %v4044_v41 = vld [vmem:[#allocation7 + $0x220] sm:$0xf0] }
 0x272   :  { %v1735_v8 = vadd.f32 %v1734_v12, %v1733_v2  ;;  %v1727_v23 = vadd.f32 %v1726_v13, %v1725_v53  ;;  %v1712_v25 = vadd.f32 %v1711_v14, %v1710_v3  ;;  %2367 = vmatpush.bf16.msrb.mxu0 %v3579_v30  ;;  %2342 = vmatpush.bf16.msra.mxu2 %v3659_v59  ;;  %v3644_v2 = vld [vmem:[#allocation7 + $0x1bc] sm:$0xf0]  ;;  %v3506_v53 = vld [vmem:[#allocation7 + $0x98] sm:$0xf]  ;;  %v3632_v12 = vld [vmem:[#allocation7 + $0x1a4] sm:$0xf0] }
 0x273   :  { %2305 = vmatpush.bf16.msrb.mxu3 %v3631_v11  ;;  %v3647_v5 = vor.u32 %v4030_v42, %v3644_v2  ;;  %v3507_v6 = vor.u32 %v3996_v7, %v3506_v53  ;;  %v3494_v13 = vld [vmem:[#allocation7 + $0x80] sm:$0xf]  ;;  %v3635_v18 = vor.u32 %v4027_v10, %v3632_v12  ;;  %v3620_v30 = vld [vmem:[#allocation7 + $0x18c] sm:$0xf0]  ;;  %v3482_v11 = vld [vmem:[#allocation7 + $0x68] sm:$0xf]  ;;  %v3699_v10 = vor.u32 %v4044_v41, %v3698_v21 }
 0x274   :  { %v1743_v49 = vmul.f32 %v1735_v8, %v4327_v57  ;;  %v1728_v33 = vrot.slane %v1727_v23, 1  ;;  %v1713_v34 = vrot.slane %v1712_v25, 1  ;;  %v3495_v22 = vor.u32 %v3993_v19, %v3494_v13  ;;  %v3530_v8 = vld [vmem:[#allocation7 + $0xc8] sm:$0xf]  ;;  %v3710_v42 = vld [vmem:[#allocation7 + $0x230] sm:$0xf] }
 0x275   :  { %v4047_v2 = vld [vmem:[#allocation7 + $0x238] sm:$0xf0]  ;;  %v3978_v7 = vld [vmem:[#allocation7 + $0x10] sm:$0xf0]  ;;  %v3686_v12 = vld [vmem:[#allocation7 + $0x200] sm:$0xf] }
 0x276   :  { %v1746_v43 = vmax.f32 %v1743_v49, 0.0  ;;  %v1729_v44 = vadd.f32 %v1728_v33, %v1727_v23  ;;  %v1714_v45 = vadd.f32 %v1713_v34, %v1712_v25  ;;  %2368 = vmatpush.bf16.msrb.mxu0 %v3567_v48  ;;  %2343 = vmatpush.bf16.msra.mxu2 %v3647_v5  ;;  %v4002_v23 = vld [vmem:[#allocation7 + $0xd0] sm:$0xf0]  ;;  %v3623_v49 = vor.u32 %v4024_v29, %v3620_v30  ;;  %v3434_v5 = vld [vmem:[#allocation7 + $0x8] sm:$0xf] }
 0x277   :  { %2306 = vmatpush.bf16.msrb.mxu3 %v3619_v9  ;;  %v3531_v26 = vor.u32 %v4002_v23, %v3530_v8  ;;  %v3990_v33 = vld [vmem:[#allocation7 + $0x70] sm:$0xf0]  ;;  %v4041_v13 = vld [vmem:[#allocation7 + $0x208] sm:$0xf0]  ;;  %v3674_v19 = vld [vmem:[#allocation7 + $0x1e8] sm:$0xf] }
 0x278   :  { %v4466_v28 = vadd.f32 1e-05, %v1746_v43  ;;  %v1742_v47 = vmul.f32 %v1729_v44, %v4327_v57  ;;  %v1717_v56 = vmul.f32 %v1714_v45, %v4327_v57  ;;  %v3483_v36 = vor.u32 %v3990_v33, %v3482_v11  ;;  %v3987_v43 = vld [vmem:[#allocation7 + $0x58] sm:$0xf0] }
 0x279   :  { %v3471_v45 = vor.u32 %v3987_v43, %v3470_v40 }
 0x27a   :  { %4097 = vrsqrt.f32 %v4466_v28  ;;  %v1745_v60 = vmax.f32 %v1742_v47, 0.0  ;;  %v4472_v0 = vsub.f32 %v4461_v54, %v1717_v56  ;;  %2369 = vmatpush.bf16.msrb.mxu0 %v3555_v1  ;;  %2344 = vmatpush.bf16.msra.mxu2 %v3635_v18  ;;  %vm1767_vm4 = vweird.f32 %v4466_v28  ;;  %v3458_v47 = vld [vmem:[#allocation7 + $0x38] sm:$0xf]  ;;  %v3984_v56 = vld [vmem:[#allocation7 + $0x40] sm:$0xf0] }
 0x27b   :  { %2351 = vmatpush.bf16.msra.mxu3 %v3519_v50  ;;  %v3459_v58 = vor.u32 %v3984_v56, %v3458_v47  ;;  %v3687_v18 = vor.u32 %v4041_v13, %v3686_v12  ;;  %v4063_v47 = vld [vmem:[#allocation9 + $0x78] sm:$0xff] }
 0x27c   :  { %v4474_v3 = vadd.f32 1e-05, %v1745_v60  ;;  %v1723_v4 = vmul.f32 %v4472_v0, %v4472_v0  ;;  %v3981_v60 = vld [vmem:[#allocation7 + $0x28] sm:$0xf0] }
 0x27d   :  { %v3447_v53 = vor.u32 %v3981_v60, %v3446_v63  ;;  %v4054_v63 = vld [vmem:[#allocation9 + $0x30] sm:$0xff] }
 0x27e   :  { %4099 = vrsqrt.f32 %v4474_v3  ;;  %v1736_v54 = vrot.slane %v1723_v4, 4  ;;  %2370 = vmatpush.bf16.msrb.mxu0 %v3543_v61  ;;  %2345 = vmatpush.bf16.msra.mxu2 %v3623_v49  ;;  %vm1757_vm7 = vweird.f32 %v4474_v3  ;;  %v4062_v60 = vld [vmem:[#allocation9 + $0x70] sm:$0xff] }
 0x27f   :  { %2352 = vmatpush.bf16.msra.mxu3 %v3507_v6 }
 0x280   :  { %v4098_v14 = vpop.eup %4097  ;;  %v1737_v17 = vadd.f32 %v1736_v54, %v1723_v4  ;;  %v3435_v54 = vor.u32 %v3978_v7, %v3434_v5 }
 0x281   :  { %v1762_v20 = vmul.f32 %v4098_v14, %v4466_v28  ;;  %vm1768_vm3 = vweird.f32 %v4098_v14 }
 0x282   :  { %v1738_v25 = vrot.slane %v1737_v17, 2  ;;  %2371 = vmatpush.bf16.msrb.mxu0 %v3531_v26  ;;  %vm1769_vm5 = vmor %vm1767_vm4, %vm1768_vm3  ;;  %v4035_v26 = vld [vmem:[#allocation7 + $0x1d8] sm:$0xf0] }
 0x283   :  { %v1763_v55 = vmul.f32 %v4098_v14, %v1762_v20  ;;  %2353 = vmatpush.bf16.msra.mxu3 %v3495_v22  ;;  %v4038_v20 = vld [vmem:[#allocation7 + $0x1f0] sm:$0xf0] }
 0x284   :  { %v4100_v31 = vpop.eup %4099  ;;  %v1739_v24 = vadd.f32 %v1738_v25, %v1737_v17  ;;  %v3675_v23 = vor.u32 %v4038_v20, %v3674_v19  ;;  %v3662_v25 = vld [vmem:[#allocation7 + $0x1d0] sm:$0xf] }
 0x285   :  { %v1764_v34 = vmul.f32 0.5, %v1763_v55  ;;  %v1752_v35 = vmul.f32 %v4100_v31, %v4474_v3  ;;  %vm1758_vm6 = vweird.f32 %v4100_v31  ;;  %v3711_v3 = vor.u32 %v4047_v2, %v3710_v42 }
 0x286   :  { %v1740_v37 = vrot.slane %v1739_v24, 1  ;;  %vm1759_vm8 = vmor %vm1757_vm7, %vm1758_vm6  ;;  %v3663_v30 = vor.u32 %v4035_v26, %v3662_v25  ;;  %v4071_v25 = vld [vmem:[#allocation9 + $0xb8] sm:$0xff] }
 0x287   :  { %v1765_v15 = vsub.f32 1.5, %v1764_v34  ;;  %v1753_v39 = vmul.f32 %v4100_v31, %v1752_v35  ;;  %2354 = vmatpush.bf16.msra.mxu3 %v3483_v36  ;;  %v3638_v34 = vld [vmem:[#allocation7 + $0x1a0] sm:$0xf]  ;;  %v4029_v35 = vld [vmem:[#allocation7 + $0x1a8] sm:$0xf0] }
 0x288   :  { %v1741_v44 = vadd.f32 %v1740_v37, %v1739_v24  ;;  %v4032_v24 = vld [vmem:[#allocation7 + $0x1c0] sm:$0xf0]  ;;  %v3626_v36 = vld [vmem:[#allocation7 + $0x188] sm:$0xf]  ;;  %v4026_v37 = vld [vmem:[#allocation7 + $0x190] sm:$0xf0] }
 0x289   :  { %v1766_v48 = vmul.f32 %v4098_v14, %v1765_v15  ;;  %v1754_v27 = vmul.f32 0.5, %v1753_v39  ;;  %v3627_v15 = vor.u32 %v4026_v37, %v3626_v36  ;;  %v4049_v36 = vld [vmem:[#allocation9 + $0x8] sm:$0xff] }
 0x28a   :  { %v1744_v51 = vmul.f32 %v1741_v44, %v4327_v57  ;;  %v4057_v37 = vld [vmem:[#allocation9 + $0x48] sm:$0xff] }
 0x28b   :  { %v1770_v46 = vsel %vm1769_vm5, %v4098_v14, %v1766_v48  ;;  %v1755_v52 = vsub.f32 1.5, %v1754_v27  ;;  %2355 = vmatpush.bf16.msra.mxu3 %v3471_v45 }
 0x28c   :  { %v1782_v9 = vmul.f32 %v1770_v46, %v4449_v16  ;;  %v1747_v38 = vmax.f32 %v1744_v51, 0.0 }
 0x28d   :  { %v1756_v59 = vmul.f32 %v4100_v31, %v1755_v52  ;;  %v4055_v52 = vld [vmem:[#allocation9 + $0x38] sm:$0xff] }
 0x28e   :  { %v1785_v50 = vmax.f32 %v1782_v9, 0.0  ;;  %v1750_v28 = vadd.f32 1e-05, %v1747_v38 }
 0x28f   :  { %v1760_v62 = vsel %vm1759_vm8, %v4100_v31, %v1756_v59  ;;  %2356 = vmatpush.bf16.msra.mxu3 %v3459_v58  ;;  %v3650_v31 = vld [vmem:[#allocation7 + $0x1b8] sm:$0xf] }
 0x290   :  { %1788 = vst [vmem:[%s4542_s7 + $0x38] sm:$0xff] %v1785_v50  ;;  %v1781_v1 = vmul.f32 %v1760_v62, %v4455_v32  ;;  %4101 = vrsqrt.f32 %v1750_v28  ;;  %v1791_v16 = vpack.c.bf16 %v1785_v50, %v1785_v50  ;;  %vm1777_vm10 = vweird.f32 %v1750_v28 }
 0x291   :  { %v3651_v33 = vor.u32 %v4032_v24, %v3650_v31 }
 0x292   :  { %v1784_v4 = vmax.f32 %v1781_v1, 0.0  ;;  %2294 = vmatmul.bf16.vlgmr.msrb.gmra.mxu2 %v1791_v16 }
 0x293   :  { %2357 = vmatpush.bf16.msra.mxu3 %v3447_v53  ;;  %2682 = vmatpush.bf16.msrb.mxu2 %v4055_v52  ;;  %v4053_v53 = vld [vmem:[#allocation9 + $0x28] sm:$0xff] }
 0x294   :  { %1787 = vst [vmem:[%s4542_s7 + $0x30] sm:$0xff] %v1784_v4  ;;  %v1790_v6 = vpack.c.bf16 %v1784_v4, %v1784_v4  ;;  %v4061_v4 = vld [vmem:[#allocation9 + $0x68] sm:$0xff] }
 0x296   :  { %v4102_v32 = vpop.eup %4101  ;;  %2281 = vmatmul.bf16.vlgmr.msrb.gmra.mxu1 %v1790_v6  ;;  %2320 = vmatmul.bf16.vlgmr.msra.gmra.mxu0 %v1790_v6 }
 0x297   :  { %v1772_v61 = vmul.f32 %v4102_v32, %v1750_v28  ;;  %2377 = vmatpush.bf16.msrb.mxu1 %v3711_v3  ;;  %2358 = vmatpush.bf16.msra.mxu3 %v3435_v54  ;;  %vm1778_vm9 = vweird.f32 %v4102_v32 }
 0x298   :  { %vm1779_vm11 = vmor %vm1777_vm10, %vm1778_vm9  ;;  %2683 = vmatpush.bf16.msrb.mxu2 %v4054_v63  ;;  %2708 = vmatpush.bf16.msra.mxu0 %v4071_v25  ;;  %v4067_v63 = vld [vmem:[#allocation9 + $0x98] sm:$0xff] }
 0x299   :  { %v1773_v14 = vmul.f32 %v4102_v32, %v1772_v61  ;;  %v4060_v61 = vld [vmem:[#allocation9 + $0x60] sm:$0xff] }
 0x29b   :  { %v1774_v17 = vmul.f32 0.5, %v1773_v14  ;;  %2378 = vmatpush.bf16.msrb.mxu1 %v3699_v10 }
 0x29c   :  { %2684 = vmatpush.bf16.msrb.mxu2 %v4053_v53 }
 0x29d   :  { %v1775_v22 = vsub.f32 1.5, %v1774_v17  ;;  %v4051_v17 = vld [vmem:[#allocation9 + $0x18] sm:$0xff] }
 0x29f   :  { %v1776_v8 = vmul.f32 %v4102_v32, %v1775_v22  ;;  %2379 = vmatpush.bf16.msrb.mxu1 %v3687_v18  ;;  %v4059_v18 = vld [vmem:[#allocation9 + $0x58] sm:$0xff] }
 0x2a1   :  { %v1780_v55 = vsel %vm1779_vm11, %v4102_v32, %v1776_v8  ;;  %v4052_v32 = vld [vmem:[#allocation9 + $0x20] sm:$0xff] }
 0x2a2   :  { %v1783_v29 = vmul.f32 %v1780_v55, %v4472_v0  ;;  %v3639_v0 = vor.u32 %v4029_v35, %v3638_v34  ;;  %2685 = vmatpush.bf16.msrb.mxu2 %v4052_v32 }
 0x2a3   :  { %2380 = vmatpush.bf16.msrb.mxu1 %v3675_v23 }
 0x2a4   :  { %v1786_v11 = vmax.f32 %v1783_v29, 0.0 }
 0x2a6   :  { %2333 = vmatmul.bf16.vlgmr.msra.gmra.mxu1 %v1791_v16  ;;  %2372 = vmatmul.bf16.vlgmr.msrb.gmra.mxu0 %v1791_v16  ;;  %1789 = vst [vmem:[%s4542_s7 + $0x40] sm:$0xff] %v1786_v11  ;;  %v1792_v49 = vpack.c.bf16 %v1786_v11, %v1786_v11  ;;  %v4058_v11 = vld [vmem:[#allocation9 + $0x50] sm:$0xff] }
 0x2a7   :  { %2381 = vmatpush.bf16.msrb.mxu1 %v3663_v30  ;;  %2686 = vmatpush.bf16.msrb.mxu2 %v4051_v17  ;;  %v4050_v30 = vld [vmem:[#allocation9 + $0x10] sm:$0xff] }
 0x2a8   :  { %2307 = vmatmul.bf16.vlgmr.msrb.gmra.mxu3 %v1792_v49  ;;  %2346 = vmatmul.bf16.vlgmr.msra.gmra.mxu2 %v1792_v49 }
 0x2a9   :  { %2695 = vmatpush.bf16.msrb.mxu3 %v4063_v47 }
 0x2ab   :  { %2382 = vmatpush.bf16.msrb.mxu1 %v3651_v33  ;;  %2687 = vmatpush.bf16.msrb.mxu2 %v4050_v30  ;;  %v4070_v33 = vld [vmem:[#allocation9 + $0xb0] sm:$0xff] }
 0x2ac   :  { %2709 = vmatpush.bf16.msra.mxu0 %v4070_v33 }
 0x2ad   :  { %2696 = vmatpush.bf16.msrb.mxu3 %v4062_v60 }
 0x2af   :  { %2383 = vmatpush.bf16.msrb.mxu1 %v3639_v0  ;;  %2688 = vmatpush.bf16.msrb.mxu2 %v4049_v36 }
 0x2b1   :  { %2697 = vmatpush.bf16.msrb.mxu3 %v4061_v4  ;;  %v4066_v4 = vld [vmem:[#allocation9 + $0x90] sm:$0xff] }
 0x2b3   :  { %2384 = vmatpush.bf16.msrb.mxu1 %v3627_v15 }
 0x2b5   :  { %2698 = vmatpush.bf16.msrb.mxu3 %v4060_v61 }
 0x2b6   :  { %2385 = vmatmul.bf16.vlgmr.msrb.gmra.mxu1 %v1792_v49 }
 0x2b8   :  { %2359 = vmatmul.bf16.vlgmr.msra.gmra.mxu3 %v1790_v6 }
 0x2b9   :  { %2699 = vmatpush.bf16.msrb.mxu3 %v4059_v18 }
 0x2bd   :  { %2700 = vmatpush.bf16.msrb.mxu3 %v4058_v11 }
 0x2c1   :  { %2701 = vmatpush.bf16.msrb.mxu3 %v4057_v37 }
 0x313   :  { %v2282_v39 = vpop.f32.mrf.mxu1  ;;  %v2321_v40 = vpop.f32.mrf.mxu0 }
 0x315   :  { %v2295_v43 = vpop.f32.mrf.mxu2 }
 0x316   :  { %v2296_v46 = vadd.f32 %v2295_v43, %v2282_v39 }
 0x31b   :  { %v2284_v44 = vpop.f32.mrf.mxu1  ;;  %v2323_v45 = vpop.f32.mrf.mxu0 }
 0x31c   :  { %v4069_v44 = vld [vmem:[#allocation9 + $0xa8] sm:$0xff] }
 0x31d   :  { %v2297_v48 = vpop.f32.mrf.mxu2  ;;  %2710 = vmatpush.bf16.msra.mxu0 %v4069_v44 }
 0x323   :  { %v2334_v27 = vpop.f32.mrf.mxu1  ;;  %v2373_v51 = vpop.f32.mrf.mxu0 }
 0x324   :  { %v2335_v56 = vadd.f32 %v2334_v27, %v2321_v40 }
 0x32b   :  { %v2308_v9 = vpop.f32.mrf.mxu3  ;;  %v2336_v38 = vpop.f32.mrf.mxu1 }
 0x32c   :  { %v2309_v58 = vadd.f32 %v2308_v9, %v2296_v46  ;;  %v2347_v59 = vpop.f32.mrf.mxu2  ;;  %v2375_v50 = vpop.f32.mrf.mxu0  ;;  %v4056_v46 = vld [vmem:[#allocation9 + $0x40] sm:$0xff] }
 0x32d   :  { %v2348_v28 = vadd.f32 %v2347_v59, %v2335_v56  ;;  %2702 = vmatpush.bf16.msrb.mxu3 %v4056_v46  ;;  %v4068_v9 = vld [vmem:[#allocation9 + $0xa0] sm:$0xff] }
 0x32e   :  { %v2390_v62 = vrot.slane %v2309_v58, 4  ;;  %2711 = vmatpush.bf16.msra.mxu0 %v4068_v9 }
 0x32f   :  { %v2396_v1 = vrot.slane %v2348_v28, 4 }
 0x330   :  { %v2391_v16 = vadd.f32 %v2390_v62, %v2309_v58 }
 0x331   :  { %v2397_v42 = vadd.f32 %v2396_v1, %v2348_v28 }
 0x332   :  { %v2392_v2 = vrot.slane %v2391_v16, 2  ;;  %2712 = vmatpush.bf16.msra.mxu0 %v4067_v63 }
 0x333   :  { %v2398_v3 = vrot.slane %v2397_v42, 2  ;;  %v2310_v5 = vpop.f32.mrf.mxu3  ;;  %v2386_v7 = vpop.f32.mrf.mxu1 }
 0x334   :  { %v2393_v6 = vadd.f32 %v2392_v2, %v2391_v16  ;;  %v2349_v21 = vpop.f32.mrf.mxu2 }
 0x335   :  { %v2399_v41 = vadd.f32 %v2398_v3, %v2397_v42 }
 0x336   :  { %v2394_v54 = vrot.slane %v2393_v6, 1  ;;  %2713 = vmatpush.bf16.msra.mxu0 %v4066_v4 }
 0x337   :  { %v2400_v10 = vrot.slane %v2399_v41, 1 }
 0x338   :  { %v2395_v12 = vadd.f32 %v2394_v54, %v2393_v6  ;;  %v4065_v6 = vld [vmem:[#allocation9 + $0x88] sm:$0xff] }
 0x339   :  { %v2401_v13 = vadd.f32 %v2400_v10, %v2399_v41  ;;  %v4064_v41 = vld [vmem:[#allocation9 + $0x80] sm:$0xff] }
 0x33a   :  { %v2408_v14 = vmul.f32 %v2395_v12, %v4327_v57  ;;  %2714 = vmatpush.bf16.msra.mxu0 %v4065_v6 }
 0x33b   :  { %v2409_v19 = vmul.f32 %v2401_v13, %v4327_v57  ;;  %v2360_v20 = vpop.f32.mrf.mxu3  ;;  %v2388_v22 = vpop.f32.mrf.mxu1 }
 0x33c   :  { %v4498_v8 = vsub.f32 %v2309_v58, %v2408_v14  ;;  %v2374_v23 = vadd.f32 %v2373_v51, %v2360_v20  ;;  %v4048_v51 = vld [vmem:[#allocation9] sm:$0xff] }
 0x33d   :  { %v4500_v26 = vsub.f32 %v2348_v28, %v2409_v19  ;;  %2689 = vmatpush.bf16.msrb.mxu2 %v4048_v51  ;;  %v4082_v51 = vld [vmem:[%s4541_s6] ss:$0 sm:$0xff] }
 0x33e   :  { %v2414_v55 = vmul.f32 %v4498_v8, %v4498_v8  ;;  %v2387_v29 = vadd.f32 %v2386_v7, %v2374_v23  ;;  %2715 = vmatpush.bf16.msra.mxu0 %v4064_v41 }
 0x33f   :  { %v2415_v31 = vmul.f32 %v4500_v26, %v4500_v26 }
 0x340   :  { %v2417_v24 = vrot.slane %v2414_v55, 4  ;;  %v2402_v49 = vrot.slane %v2387_v29, 4 }
 0x341   :  { %v2423_v34 = vrot.slane %v2415_v31, 4 }
 0x342   :  { %v2418_v35 = vadd.f32 %v2417_v24, %v2414_v55  ;;  %v2403_v0 = vadd.f32 %v2402_v49, %v2387_v29 }
 0x343   :  { %v2424_v15 = vadd.f32 %v2423_v34, %v2415_v31  ;;  %v2362_v39 = vpop.f32.mrf.mxu3 }
 0x344   :  { %v2419_v40 = vrot.slane %v2418_v35, 2  ;;  %v2404_v43 = vrot.slane %v2403_v0, 2 }
 0x345   :  { %v2425_v45 = vrot.slane %v2424_v15, 2 }
 0x346   :  { %v2420_v48 = vadd.f32 %v2419_v40, %v2418_v35  ;;  %v2405_v27 = vadd.f32 %v2404_v43, %v2403_v0 }
 0x347   :  { %v2426_v52 = vadd.f32 %v2425_v45, %v2424_v15 }
 0x348   :  { %v2421_v47 = vrot.slane %v2420_v48, 1  ;;  %v2406_v56 = vrot.slane %v2405_v27, 1 }
 0x349   :  { %v2427_v38 = vrot.slane %v2426_v52, 1 }
 0x34a   :  { %v2422_v58 = vadd.f32 %v2421_v47, %v2420_v48  ;;  %v2407_v59 = vadd.f32 %v2406_v56, %v2405_v27 }
 0x34b   :  { %v2428_v50 = vadd.f32 %v2427_v38, %v2426_v52 }
 0x34c   :  { %v2435_v28 = vmul.f32 %v2422_v58, %v4327_v57  ;;  %v2410_v62 = vmul.f32 %v2407_v59, %v4327_v57 }
 0x34d   :  { %v2436_v60 = vmul.f32 %v2428_v50, %v4327_v57 }
 0x34e   :  { %v2438_v1 = vmax.f32 %v2435_v28, 0.0  ;;  %v4509_v16 = vsub.f32 %v2387_v29, %v2410_v62 }
 0x34f   :  { %v2439_v42 = vmax.f32 %v2436_v60, 0.0 }
 0x350   :  { %v2441_v2 = vadd.f32 1e-05, %v2438_v1  ;;  %v2416_v53 = vmul.f32 %v4509_v16, %v4509_v16 }
 0x351   :  { %v2442_v3 = vadd.f32 1e-05, %v2439_v42 }
 0x352   :  { %4103 = vrsqrt.f32 %v2441_v2  ;;  %v2429_v5 = vrot.slane %v2416_v53, 4  ;;  %vm2450_vm14 = vweird.f32 %v2441_v2 }
 0x353   :  { %4105 = vrsqrt.f32 %v2442_v3  ;;  %vm2460_vm0 = vweird.f32 %v2442_v3 }
 0x354   :  { %v2430_v7 = vadd.f32 %v2429_v5, %v2416_v53 }
 0x356   :  { %v2431_v21 = vrot.slane %v2430_v7, 2 }
 0x358   :  { %v4104_v54 = vpop.eup %4103  ;;  %v2432_v32 = vadd.f32 %v2431_v21, %v2430_v7 }
 0x359   :  { %v4106_v61 = vpop.eup %4105  ;;  %v2445_v10 = vmul.f32 %v4104_v54, %v2441_v2  ;;  %vm2451_vm12 = vweird.f32 %v4104_v54 }
 0x35a   :  { %v2455_v12 = vmul.f32 %v4106_v61, %v2442_v3  ;;  %v2433_v13 = vrot.slane %v2432_v32, 1  ;;  %vm2461_vm13 = vweird.f32 %v4106_v61  ;;  %vm2452_vm15 = vmor %vm2450_vm14, %vm2451_vm12 }
 0x35b   :  { %v2446_v14 = vmul.f32 %v4104_v54, %v2445_v10  ;;  %vm2462_vm1 = vmor %vm2460_vm0, %vm2461_vm13 }
 0x35c   :  { %v2456_v17 = vmul.f32 %v4106_v61, %v2455_v12  ;;  %v2434_v18 = vadd.f32 %v2433_v13, %v2432_v32 }
 0x35d   :  { %v2447_v19 = vmul.f32 0.5, %v2446_v14 }
 0x35e   :  { %v2457_v20 = vmul.f32 0.5, %v2456_v17  ;;  %v2437_v22 = vmul.f32 %v2434_v18, %v4327_v57 }
 0x35f   :  { %v2448_v23 = vsub.f32 1.5, %v2447_v19 }
 0x360   :  { %v2458_v25 = vsub.f32 1.5, %v2457_v20  ;;  %v2440_v55 = vmax.f32 %v2437_v22, 0.0 }
 0x361   :  { %v2449_v29 = vmul.f32 %v4104_v54, %v2448_v23 }
 0x362   :  { %v2459_v30 = vmul.f32 %v4106_v61, %v2458_v25  ;;  %v2443_v11 = vadd.f32 1e-05, %v2440_v55 }
 0x363   :  { %v2453_v31 = vsel %vm2452_vm15, %v4104_v54, %v2449_v29 }
 0x364   :  { %v2474_v24 = vmul.f32 %v2453_v31, %v4498_v8  ;;  %v2463_v49 = vsel %vm2462_vm1, %v4106_v61, %v2459_v30  ;;  %4107 = vrsqrt.f32 %v2443_v11  ;;  %vm2470_vm3 = vweird.f32 %v2443_v11 }
 0x365   :  { %v2475_v33 = vmul.f32 %v2463_v49, %v4500_v26 }
 0x366   :  { %v2477_v57 = vmax.f32 %v2474_v24, 0.0 }
 0x367   :  { %v2478_v34 = vmax.f32 %v2475_v33, 0.0 }
 0x368   :  { %2480 = vst [vmem:[%s4542_s7 + $0x48] sm:$0xff] %v2477_v57  ;;  %v2483_v35 = vpack.c.bf16 %v2477_v57, %v2477_v57 }
 0x369   :  { %2481 = vst [vmem:[%s4542_s7 + $0x50] sm:$0xff] %v2478_v34  ;;  %v2484_v0 = vpack.c.bf16 %v2478_v34, %v2478_v34 }
 0x36a   :  { %v4108_v36 = vpop.eup %4107  ;;  %2690 = vmatmul.bf16.vlgmr.msrb.gmra.mxu2 %v2483_v35 }
 0x36b   :  { %v2465_v37 = vmul.f32 %v4108_v36, %v2443_v11  ;;  %2703 = vmatmul.bf16.vlgmr.msrb.gmra.mxu3 %v2484_v0  ;;  %vm2471_vm2 = vweird.f32 %v4108_v36 }
 0x36c   :  { %vm2472_vm4 = vmor %vm2470_vm3, %vm2471_vm2 }
 0x36d   :  { %v2466_v8 = vmul.f32 %v4108_v36, %v2465_v37 }
 0x36f   :  { %v2467_v15 = vmul.f32 0.5, %v2466_v8 }
 0x371   :  { %v2468_v39 = vsub.f32 1.5, %v2467_v15 }
 0x373   :  { %v2469_v26 = vmul.f32 %v4108_v36, %v2468_v39 }
 0x375   :  { %v2473_v40 = vsel %vm2472_vm4, %v4108_v36, %v2469_v26 }
 0x376   :  { %v2476_v43 = vmul.f32 %v2473_v40, %v4509_v16 }
 0x378   :  { %v2479_v44 = vmax.f32 %v2476_v43, 0.0 }
 0x37a   :  { %2482 = vst [vmem:[%s4542_s7 + $0x58] sm:$0xff] %v2479_v44  ;;  %v2485_v45 = vpack.c.bf16 %v2479_v44, %v2479_v44 }
 0x37c   :  { %2716 = vmatmul.bf16.vlgmr.msra.gmra.mxu0 %v2485_v45 }
 0x3ed   :  { %v2691_v48 = vpop.f32.mrf.mxu2 }
 0x3ee   :  { %v2704_v27 = vpop.f32.mrf.mxu3  ;;  %v2692_v46 = vadd.f32 %v4082_v51, %v2691_v48 }
 0x3f0   :  { %v2705_v56 = vadd.f32 %v2704_v27, %v2692_v46 }
 0x3f5   :  { %v2693_v52 = vpop.f32.mrf.mxu2 }
 0x3f6   :  { %v2706_v47 = vpop.f32.mrf.mxu3 }
 0x3f9   :  { %v2717_v9 = vpop.f32.mrf.mxu0 }
 0x3fa   :  { %v2718_v38 = vadd.f32 %v2717_v9, %v2705_v56 }
 0x3fc   :  { %2721 = vst [vmem:[%s4542_s7 + $0x60] sm:$0xff] %v2718_v38  ;;  %2722 = vmax.xlane.f32.xlu0 %v2718_v38 }
 0x401   :  { %v2719_v58 = vpop.f32.mrf.mxu0 }
 0x46f   :  { %v2723_v59 = vpop.xlane.xlu0 %2722 }
 0x470   :  { %v2724_v50 = vsub.f32 %v2718_v38, %v2723_v59 }
 0x472   :  { %v2725_v28 = vmul.f32 1.442695, %v2724_v50 }
 0x474   :  { %4109 = vpow2.f32 %v2725_v28 }
 0x47a   :  { %v4110_v62 = vpop.eup %4109 }
 0x47b   :  { %2727 = vadd.xlane.f32.xlu0 %v4110_v62 }
 0x4ee   :  { %v2728_v63 = vpop.xlane.xlu0 %2727 }
 0x4ef   :  { %4111 = vrcp.f32 %v2728_v63  ;;  %v2740_v42 = vand.u32 2147483648, %v2728_v63  ;;  %v2738_v53 = vand.u32 2147483647, %v2728_v63  ;;  %vm2734_vm6 = vweird.f32 %v2728_v63 }
 0x4f1   :  { %v2741_v3 = vor.u32 1.1754944e-38, %v2740_v42  ;;  %vm2739_vm8 = vcmp.eq.f32.partialorder %v2738_v53, 8.507059e+37 }
 0x4f5   :  { %v4112_v60 = vpop.eup %4111 }
 0x4f6   :  { %v2730_v1 = vmul.f32 %v4112_v60, %v2728_v63  ;;  %vm2735_vm5 = vweird.f32 %v4112_v60 }
 0x4f7   :  { %vm2736_vm7 = vmor %vm2734_vm6, %vm2735_vm5 }
 0x4f8   :  { %v2731_v16 = vsub.f32 1.0, %v2730_v1 }
 0x4fa   :  { %v2732_v2 = vmul.f32 %v4112_v60, %v2731_v16 }
 0x4fc   :  { %v2733_v4 = vadd.f32 %v4112_v60, %v2732_v2 }
 0x4fe   :  { %v2737_v5 = vsel %vm2736_vm7, %v4112_v60, %v2733_v4 }
 0x4ff   :  { %v2742_v7 = vsel %vm2739_vm8, %v2741_v3, %v2737_v5 }
 0x500   :  { %v2743_v6 = vmul.f32 %v4110_v62, %v2742_v7 }
 0x502   :  { %2744 = vst [vmem:[%s4542_s7 + $0x68] sm:$0xff] %v2743_v6 }
 0x503   :  { %2749 = vsyncpa [#allocation3], 1 }
 0x504   :  { %2750 = vsyncpa [#allocation5], 1 }
 0x505   :  { %2751 = vsyncpa [#allocation8], 1 }

</bundles_post_ra>
